<compile_context>
chip_gen: v6e
topology: v6e:2x2x1
jax: 0.10.0
libtpu: 0.0.40
codegen_flags: <defaults>
</compile_context>

<pallas_src>
import functools

import jax
import jax.numpy as jnp
from jax.experimental import pallas as pl
from jax.experimental.pallas import tpu as pltpu


def mlp_kernel(x_ref, w1_ref, b1_ref, dw_ref, bdw_ref, w2_ref, b2_ref,
               msk_ref, o_ref, *, W):
    # x_ref: (1, Bb*Cin, HW) -- one batch group per grid step.
    HW = x_ref.shape[-1]
    x = x_ref[0]                                   # (Bb*Cin, HW) f32

    # ---- fc1: 1x1 conv as a block-diagonal f32 MXU matmul (MXU is idle
    #      otherwise; this removes ~2*Cin VPU MAC passes per step). ----
    h = jnp.dot(w1_ref[...], x, preferred_element_type=jnp.float32)
    h = h + b1_ref[...]                            # (Bb*Chid, HW)

    # ---- depthwise 3x3 conv, stride 1, zero padding 1.  Each tap is a cyclic
    #      lane-roll of the flattened image (XLU) times a precomputed edge
    #      mask row and the per-channel tap weight. ----
    dw = dw_ref[...]                               # (Bb*Chid, 9), t = (dy+1)*3+(dx+1)
    msk = msk_ref[...]                             # (9, HW) f32 {0,1}
    acc = h * dw[:, 4:5]                           # centre tap: always in-bounds
    for dy in (-1, 0, 1):
        for dx in (-1, 0, 1):
            if dy == 0 and dx == 0:
                continue
            t = (dy + 1) * 3 + (dx + 1)
            shift = (-(dy * W + dx)) % HW          # shifted[i] = h[i + dy*W + dx]
            shifted = pltpu.roll(h, shift, axis=1)
            acc = acc + (shifted * msk[t:t + 1, :]) * dw[:, t:t + 1]
    acc = acc + bdw_ref[...]                       # (Bb*Chid, 1) broadcast

    # ---- GELU, tanh approximation -> EUP slot (vs. torch's exact erf: ~1e-3
    #      deviation, documented).  dropout(p=0.0) is the identity. ----
    act = jax.nn.gelu(acc, approximate=True)

    # ---- fc2: 1x1 conv as a block-diagonal f32 MXU matmul (no bf16 casts). --
    y = jnp.dot(w2_ref[...], act, preferred_element_type=jnp.float32)
    y = y + b2_ref[...]                            # (Bb*Cout, 1) broadcast
    o_ref[0] = y.astype(o_ref.dtype)               # lane- & sublane-dense store


def _pick_batch_block(B, Cin, Cout):
    """Pack enough batch elements per step to fill the 8 f32 sublanes."""
    widest = max(Cin, Cout, 1)
    bb = max(1, 8 // widest)
    bb = min(bb, B)
    while bb > 1 and B % bb != 0:
        bb -= 1
    return bb


def mlp_pallas(x_nchw, params, *, batch_block=None):
    """x_nchw: (B, Cin, H, W) float32. Returns (B, Cout, H, W)."""
    w1, b1, dw, bdw, w2, b2 = (params["w1"], params["b1"], params["dw"],
                               params["bdw"], params["w2"], params["b2"])
    B, Cin, H, W = x_nchw.shape
    Chid = w1.shape[1]
    Cout = w2.shape[1]
    HW = H * W

    Bb = batch_block or _pick_batch_block(B, Cin, Cout)
    G = B // Bb
    Ri, Rh, Ro = Bb * Cin, Bb * Chid, Bb * Cout

    # Free row-major reshape: (B, Cin, H, W) -> (G, Bb*Cin, H*W).
    x3 = x_nchw.reshape(G, Ri, HW)

    # Block-diagonal weights so the packed batch stays a plain 2-D matmul
    # inside the kernel (tiny: Bb^2 * Chid * max(Cin, Cout) floats).
    eye = jnp.eye(Bb, dtype=jnp.float32)
    w1bd = jnp.kron(eye, jnp.transpose(w1))          # (Bb*Chid, Bb*Cin)
    w2bd = jnp.kron(eye, jnp.transpose(w2))          # (Bb*Cout, Bb*Chid)
    b1bd = jnp.tile(jnp.transpose(b1), (Bb, 1))      # (Bb*Chid, 1)
    bdwbd = jnp.tile(jnp.transpose(bdw), (Bb, 1))    # (Bb*Chid, 1)
    b2bd = jnp.tile(jnp.transpose(b2), (Bb, 1))      # (Bb*Cout, 1)
    dwbd = jnp.tile(jnp.transpose(dw.reshape(9, Chid)), (Bb, 1))  # (Bb*Chid, 9)

    # Precomputed per-tap zero-padding masks (keeps iota/div/cmp off the VPU;
    # also handles non-power-of-two W for free).  Tap t=(dy+1)*3+(dx+1) is
    # valid at output (y, x) iff source (y+dy, x+dx) lies inside the image.
    yy = jnp.arange(HW, dtype=jnp.int32) // W
    xx = jnp.arange(HW, dtype=jnp.int32) % W
    rows = []
    for dy in (-1, 0, 1):
        for dx in (-1, 0, 1):
            ok = ((yy + dy >= 0) & (yy + dy < H) &
                  (xx + dx >= 0) & (xx + dx < W))
            rows.append(ok.astype(jnp.float32))
    tap_mask = jnp.stack(rows, axis=0)               # (9, HW)

    kernel = functools.partial(mlp_kernel, W=W)

    out3 = pl.pallas_call(
        kernel,
        out_shape=jax.ShapeDtypeStruct((G, Ro, HW), jnp.float32),
        grid_spec=pltpu.PrefetchScalarGridSpec(
            num_scalar_prefetch=0,
            grid=(G,),
            in_specs=[
                pl.BlockSpec((1, Ri, HW), lambda g: (g, 0, 0)),
                pl.BlockSpec((Rh, Ri), lambda g: (0, 0)),
                pl.BlockSpec((Rh, 1), lambda g: (0, 0)),
                pl.BlockSpec((Rh, 9), lambda g: (0, 0)),
                pl.BlockSpec((Rh, 1), lambda g: (0, 0)),
                pl.BlockSpec((Ro, Rh), lambda g: (0, 0)),
                pl.BlockSpec((Ro, 1), lambda g: (0, 0)),
                pl.BlockSpec((9, HW), lambda g: (0, 0)),
            ],
            out_specs=pl.BlockSpec((1, Ro, HW), lambda g: (g, 0, 0)),
        ),
        compiler_params=pltpu.CompilerParams(
            dimension_semantics=("parallel",)),   # batch groups are independent
    )(x3, w1bd, b1bd, dwbd, bdwbd, w2bd, b2bd, tap_mask)

    return out3.reshape(B, Cout, H, W)


def mlp_reference(x_nchw, params):
    """Pure-JAX reference of the PyTorch forward (NCHW semantics, exact GELU)."""
    w1, b1, dw, bdw, w2, b2 = (params["w1"], params["b1"], params["dw"],
                               params["bdw"], params["w2"], params["b2"])
    x = jnp.transpose(x_nchw, (0, 2, 3, 1))             # NHWC
    h = jnp.einsum("bhwc,cd->bhwd", x, w1) + b1[0]
    # depthwise 3x3, pad 1
    hp = jnp.pad(h, ((0, 0), (1, 1), (1, 1), (0, 0)))
    H, W = h.shape[1], h.shape[2]
    acc = jnp.zeros_like(h)
    for dy in range(3):
        for dx in range(3):
            acc = acc + hp[:, dy:dy + H, dx:dx + W, :] * dw[dy, dx, :]
    acc = acc + bdw[0]
    act = jax.nn.gelu(acc, approximate=False)            # torch.nn.GELU default
    y = jnp.einsum("bhwd,de->bhwe", act, w2) + b2[0]
    return jnp.transpose(y, (0, 3, 1, 2))


def init_params(key, in_features, hidden_features, out_features):
    ks = jax.random.split(key, 6)
    scale = 0.1
    return {
        # fc1: Conv2d(in, hidden, 1) -> weight stored as (Cin, Chid)
        "w1": scale * jax.random.normal(ks[0], (in_features, hidden_features), jnp.float32),
        "b1": scale * jax.random.normal(ks[1], (1, hidden_features), jnp.float32),
        # dwconv: Conv2d(hidden, hidden, 3, groups=hidden) -> (3, 3, Chid)
        "dw": scale * jax.random.normal(ks[2], (3, 3, hidden_features), jnp.float32),
        "bdw": scale * jax.random.normal(ks[3], (1, hidden_features), jnp.float32),
        # fc2: Conv2d(hidden, out, 1) -> (Chid, Cout)
        "w2": scale * jax.random.normal(ks[4], (hidden_features, out_features), jnp.float32),
        "b2": scale * jax.random.normal(ks[5], (1, out_features), jnp.float32),
    }


if __name__ == "__main__":
    B, Cin, H, W = 2, 4, 16, 16
    hidden = 32
    Cout = Cin  # out_features defaults to in_features

    key = jax.random.PRNGKey(0)
    kx, kp = jax.random.split(key)
    x = jax.random.normal(kx, (B, Cin, H, W), jnp.float32)
    params = init_params(kp, Cin, hidden, Cout)

    out = mlp_pallas(x, params)
    out = jax.block_until_ready(out)

    ref = mlp_reference(x, params)
    assert out.shape == (B, Cout, H, W)
    # Dominant deviation vs. the pure-f32 exact-erf reference is the tanh GELU
    # approximation (~1e-3) plus default-precision MXU matmul rounding.
    assert jnp.allclose(out, ref, rtol=1e-2, atol=1e-2), "mismatch vs reference"

    print("KERNEL_OK")
</pallas_src>

<mosaic_0001>
module attributes {stable_mosaic.version = 11 : i64} {
  func.func @mlp_kernel(%arg0: i32, %arg1: memref<1x8x256xf32, #tpu.memory_space<vmem>>, %arg2: memref<64x8xf32, #tpu.memory_space<vmem>>, %arg3: memref<64x1xf32, #tpu.memory_space<vmem>>, %arg4: memref<64x9xf32, #tpu.memory_space<vmem>>, %arg5: memref<64x1xf32, #tpu.memory_space<vmem>>, %arg6: memref<8x64xf32, #tpu.memory_space<vmem>>, %arg7: memref<8x1xf32, #tpu.memory_space<vmem>>, %arg8: memref<9x256xf32, #tpu.memory_space<vmem>>, %arg9: memref<1x8x256xf32, #tpu.memory_space<vmem>>) attributes {dimension_semantics = [#tpu.dimension_semantics<parallel>], iteration_bounds = array<i64: 1>, scalar_prefetch = 0 : i64, scratch_operands = 0 : i64, tpu.core_type = #tpu.core_type<tc>, window_params = [{transform_indices = @transform_0, window_bounds = array<i64: 1, 8, 256>}, {pipeline_mode = #tpu.pipeline_mode<synchronous>, transform_indices = @transform_1, window_bounds = array<i64: 64, 8>}, {pipeline_mode = #tpu.pipeline_mode<synchronous>, transform_indices = @transform_2, window_bounds = array<i64: 64, 1>}, {pipeline_mode = #tpu.pipeline_mode<synchronous>, transform_indices = @transform_3, window_bounds = array<i64: 64, 9>}, {pipeline_mode = #tpu.pipeline_mode<synchronous>, transform_indices = @transform_4, window_bounds = array<i64: 64, 1>}, {pipeline_mode = #tpu.pipeline_mode<synchronous>, transform_indices = @transform_5, window_bounds = array<i64: 8, 64>}, {pipeline_mode = #tpu.pipeline_mode<synchronous>, transform_indices = @transform_6, window_bounds = array<i64: 8, 1>}, {pipeline_mode = #tpu.pipeline_mode<synchronous>, transform_indices = @transform_7, window_bounds = array<i64: 9, 256>}, {transform_indices = @transform_8, window_bounds = array<i64: 1, 8, 256>}]} {
    %c0 = arith.constant 0 : index
    %c0_0 = arith.constant 0 : index
    %c0_1 = arith.constant 0 : index
    %0 = vector.load %arg1[%c0, %c0_0, %c0_1] : memref<1x8x256xf32, #tpu.memory_space<vmem>>, vector<1x8x256xf32>
    %1 = vector.shape_cast %0 : vector<1x8x256xf32> to vector<8x256xf32>
    %c0_2 = arith.constant 0 : index
    %c0_3 = arith.constant 0 : index
    %2 = vector.load %arg2[%c0_2, %c0_3] : memref<64x8xf32, #tpu.memory_space<vmem>>, vector<64x8xf32>
    %cst = arith.constant dense<0.000000e+00> : vector<64x256xf32>
    %3 = tpu.matmul %2, %1, %cst {dimension_numbers = #tpu.dot_dimension_numbers<[1], [0], [0], [1], [0, 0, 1, 1], [], []>} : vector<64x8xf32>, vector<8x256xf32>, vector<64x256xf32> -> vector<64x256xf32>
    %c0_4 = arith.constant 0 : index
    %c0_5 = arith.constant 0 : index
    %4 = vector.load %arg3[%c0_4, %c0_5] : memref<64x1xf32, #tpu.memory_space<vmem>>, vector<64x1xf32>
    %5 = vector.broadcast %4 : vector<64x1xf32> to vector<64x256xf32>
    %6 = arith.addf %3, %5 : vector<64x256xf32>
    %c0_6 = arith.constant 0 : index
    %c0_7 = arith.constant 0 : index
    %7 = vector.load %arg4[%c0_6, %c0_7] : memref<64x9xf32, #tpu.memory_space<vmem>>, vector<64x9xf32>
    %c0_8 = arith.constant 0 : index
    %c0_9 = arith.constant 0 : index
    %8 = vector.load %arg8[%c0_8, %c0_9] : memref<9x256xf32, #tpu.memory_space<vmem>>, vector<9x256xf32>
    %9 = vector.extract_strided_slice %7 {offsets = [0, 4], sizes = [64, 1], strides = [1, 1]} : vector<64x9xf32> to vector<64x1xf32>
    %10 = vector.broadcast %9 : vector<64x1xf32> to vector<64x256xf32>
    %11 = arith.mulf %6, %10 : vector<64x256xf32>
    %c17_i32 = arith.constant 17 : i32
    %12 = tpu.dynamic_rotate %6 by %c17_i32 dim 1 : vector<64x256xf32>, i32 -> vector<64x256xf32>
    %13 = vector.extract_strided_slice %8 {offsets = [0, 0], sizes = [1, 256], strides = [1, 1]} : vector<9x256xf32> to vector<1x256xf32>
    %14 = vector.broadcast %13 : vector<1x256xf32> to vector<64x256xf32>
    %15 = arith.mulf %12, %14 : vector<64x256xf32>
    %16 = vector.extract_strided_slice %7 {offsets = [0, 0], sizes = [64, 1], strides = [1, 1]} : vector<64x9xf32> to vector<64x1xf32>
    %17 = vector.broadcast %16 : vector<64x1xf32> to vector<64x256xf32>
    %18 = arith.mulf %15, %17 : vector<64x256xf32>
    %19 = arith.addf %11, %18 : vector<64x256xf32>
    %c16_i32 = arith.constant 16 : i32
    %20 = tpu.dynamic_rotate %6 by %c16_i32 dim 1 : vector<64x256xf32>, i32 -> vector<64x256xf32>
    %21 = vector.extract_strided_slice %8 {offsets = [1, 0], sizes = [1, 256], strides = [1, 1]} : vector<9x256xf32> to vector<1x256xf32>
    %22 = vector.broadcast %21 : vector<1x256xf32> to vector<64x256xf32>
    %23 = arith.mulf %20, %22 : vector<64x256xf32>
    %24 = vector.extract_strided_slice %7 {offsets = [0, 1], sizes = [64, 1], strides = [1, 1]} : vector<64x9xf32> to vector<64x1xf32>
    %25 = vector.broadcast %24 : vector<64x1xf32> to vector<64x256xf32>
    %26 = arith.mulf %23, %25 : vector<64x256xf32>
    %27 = arith.addf %19, %26 : vector<64x256xf32>
    %c15_i32 = arith.constant 15 : i32
    %28 = tpu.dynamic_rotate %6 by %c15_i32 dim 1 : vector<64x256xf32>, i32 -> vector<64x256xf32>
    %29 = vector.extract_strided_slice %8 {offsets = [2, 0], sizes = [1, 256], strides = [1, 1]} : vector<9x256xf32> to vector<1x256xf32>
    %30 = vector.broadcast %29 : vector<1x256xf32> to vector<64x256xf32>
    %31 = arith.mulf %28, %30 : vector<64x256xf32>
    %32 = vector.extract_strided_slice %7 {offsets = [0, 2], sizes = [64, 1], strides = [1, 1]} : vector<64x9xf32> to vector<64x1xf32>
    %33 = vector.broadcast %32 : vector<64x1xf32> to vector<64x256xf32>
    %34 = arith.mulf %31, %33 : vector<64x256xf32>
    %35 = arith.addf %27, %34 : vector<64x256xf32>
    %c1_i32 = arith.constant 1 : i32
    %36 = tpu.dynamic_rotate %6 by %c1_i32 dim 1 : vector<64x256xf32>, i32 -> vector<64x256xf32>
    %37 = vector.extract_strided_slice %8 {offsets = [3, 0], sizes = [1, 256], strides = [1, 1]} : vector<9x256xf32> to vector<1x256xf32>
    %38 = vector.broadcast %37 : vector<1x256xf32> to vector<64x256xf32>
    %39 = arith.mulf %36, %38 : vector<64x256xf32>
    %40 = vector.extract_strided_slice %7 {offsets = [0, 3], sizes = [64, 1], strides = [1, 1]} : vector<64x9xf32> to vector<64x1xf32>
    %41 = vector.broadcast %40 : vector<64x1xf32> to vector<64x256xf32>
    %42 = arith.mulf %39, %41 : vector<64x256xf32>
    %43 = arith.addf %35, %42 : vector<64x256xf32>
    %c255_i32 = arith.constant 255 : i32
    %44 = tpu.dynamic_rotate %6 by %c255_i32 dim 1 : vector<64x256xf32>, i32 -> vector<64x256xf32>
    %45 = vector.extract_strided_slice %8 {offsets = [5, 0], sizes = [1, 256], strides = [1, 1]} : vector<9x256xf32> to vector<1x256xf32>
    %46 = vector.broadcast %45 : vector<1x256xf32> to vector<64x256xf32>
    %47 = arith.mulf %44, %46 : vector<64x256xf32>
    %48 = vector.extract_strided_slice %7 {offsets = [0, 5], sizes = [64, 1], strides = [1, 1]} : vector<64x9xf32> to vector<64x1xf32>
    %49 = vector.broadcast %48 : vector<64x1xf32> to vector<64x256xf32>
    %50 = arith.mulf %47, %49 : vector<64x256xf32>
    %51 = arith.addf %43, %50 : vector<64x256xf32>
    %c241_i32 = arith.constant 241 : i32
    %52 = tpu.dynamic_rotate %6 by %c241_i32 dim 1 : vector<64x256xf32>, i32 -> vector<64x256xf32>
    %53 = vector.extract_strided_slice %8 {offsets = [6, 0], sizes = [1, 256], strides = [1, 1]} : vector<9x256xf32> to vector<1x256xf32>
    %54 = vector.broadcast %53 : vector<1x256xf32> to vector<64x256xf32>
    %55 = arith.mulf %52, %54 : vector<64x256xf32>
    %56 = vector.extract_strided_slice %7 {offsets = [0, 6], sizes = [64, 1], strides = [1, 1]} : vector<64x9xf32> to vector<64x1xf32>
    %57 = vector.broadcast %56 : vector<64x1xf32> to vector<64x256xf32>
    %58 = arith.mulf %55, %57 : vector<64x256xf32>
    %59 = arith.addf %51, %58 : vector<64x256xf32>
    %c240_i32 = arith.constant 240 : i32
    %60 = tpu.dynamic_rotate %6 by %c240_i32 dim 1 : vector<64x256xf32>, i32 -> vector<64x256xf32>
    %61 = vector.extract_strided_slice %8 {offsets = [7, 0], sizes = [1, 256], strides = [1, 1]} : vector<9x256xf32> to vector<1x256xf32>
    %62 = vector.broadcast %61 : vector<1x256xf32> to vector<64x256xf32>
    %63 = arith.mulf %60, %62 : vector<64x256xf32>
    %64 = vector.extract_strided_slice %7 {offsets = [0, 7], sizes = [64, 1], strides = [1, 1]} : vector<64x9xf32> to vector<64x1xf32>
    %65 = vector.broadcast %64 : vector<64x1xf32> to vector<64x256xf32>
    %66 = arith.mulf %63, %65 : vector<64x256xf32>
    %67 = arith.addf %59, %66 : vector<64x256xf32>
    %c239_i32 = arith.constant 239 : i32
    %68 = tpu.dynamic_rotate %6 by %c239_i32 dim 1 : vector<64x256xf32>, i32 -> vector<64x256xf32>
    %69 = vector.extract_strided_slice %8 {offsets = [8, 0], sizes = [1, 256], strides = [1, 1]} : vector<9x256xf32> to vector<1x256xf32>
    %70 = vector.broadcast %69 : vector<1x256xf32> to vector<64x256xf32>
    %71 = arith.mulf %68, %70 : vector<64x256xf32>
    %72 = vector.extract_strided_slice %7 {offsets = [0, 8], sizes = [64, 1], strides = [1, 1]} : vector<64x9xf32> to vector<64x1xf32>
    %73 = vector.broadcast %72 : vector<64x1xf32> to vector<64x256xf32>
    %74 = arith.mulf %71, %73 : vector<64x256xf32>
    %75 = arith.addf %67, %74 : vector<64x256xf32>
    %c0_10 = arith.constant 0 : index
    %c0_11 = arith.constant 0 : index
    %76 = vector.load %arg5[%c0_10, %c0_11] : memref<64x1xf32, #tpu.memory_space<vmem>>, vector<64x1xf32>
    %77 = vector.broadcast %76 : vector<64x1xf32> to vector<64x256xf32>
    %78 = arith.addf %75, %77 : vector<64x256xf32>
    %79 = arith.mulf %78, %78 : vector<64x256xf32>
    %80 = arith.mulf %78, %79 : vector<64x256xf32>
    %cst_12 = arith.constant 4.471500e-02 : f32
    %81 = vector.broadcast %cst_12 : f32 to vector<64x256xf32>
    %82 = arith.mulf %81, %80 : vector<64x256xf32>
    %83 = arith.addf %78, %82 : vector<64x256xf32>
    %cst_13 = arith.constant 0.797884583 : f32
    %84 = vector.broadcast %cst_13 : f32 to vector<64x256xf32>
    %85 = arith.mulf %84, %83 : vector<64x256xf32>
    %86 = math.tanh %85 : vector<64x256xf32>
    %cst_14 = arith.constant 1.000000e+00 : f32
    %87 = vector.broadcast %cst_14 : f32 to vector<64x256xf32>
    %88 = arith.addf %87, %86 : vector<64x256xf32>
    %cst_15 = arith.constant 5.000000e-01 : f32
    %89 = vector.broadcast %cst_15 : f32 to vector<64x256xf32>
    %90 = arith.mulf %89, %88 : vector<64x256xf32>
    %91 = arith.mulf %78, %90 : vector<64x256xf32>
    %c0_16 = arith.constant 0 : index
    %c0_17 = arith.constant 0 : index
    %92 = vector.load %arg6[%c0_16, %c0_17] : memref<8x64xf32, #tpu.memory_space<vmem>>, vector<8x64xf32>
    %cst_18 = arith.constant dense<0.000000e+00> : vector<8x256xf32>
    %93 = tpu.matmul %92, %91, %cst_18 {dimension_numbers = #tpu.dot_dimension_numbers<[1], [0], [0], [1], [0, 0, 1, 1], [], []>} : vector<8x64xf32>, vector<64x256xf32>, vector<8x256xf32> -> vector<8x256xf32>
    %c0_19 = arith.constant 0 : index
    %c0_20 = arith.constant 0 : index
    %94 = vector.load %arg7[%c0_19, %c0_20] : memref<8x1xf32, #tpu.memory_space<vmem>>, vector<8x1xf32>
    %95 = vector.broadcast %94 : vector<8x1xf32> to vector<8x256xf32>
    %96 = arith.addf %93, %95 : vector<8x256xf32>
    %c0_21 = arith.constant 0 : index
    %c0_22 = arith.constant 0 : index
    %c0_23 = arith.constant 0 : index
    %97 = vector.load %arg9[%c0_21, %c0_22, %c0_23] : memref<1x8x256xf32, #tpu.memory_space<vmem>>, vector<1x8x256xf32>
    %98 = vector.shape_cast %97 : vector<1x8x256xf32> to vector<8x256xf32>
    %99 = vector.shape_cast %96 : vector<8x256xf32> to vector<1x8x256xf32>
    tpu.vector_store %arg9[%c0_21, %c0_22, %c0_23], %99 {strides = array<i32>} : memref<1x8x256xf32, #tpu.memory_space<vmem>>, vector<1x8x256xf32>,
    return
  }
  func.func @transform_0(%arg0: i32) -> (i32, i32, i32) {
    %c0_i32 = arith.constant 0 : i32
    %c0_i32_0 = arith.constant 0 : i32
    %c0_i32_1 = arith.constant 0 : i32
    return %arg0, %c0_i32, %c0_i32_0 : i32, i32, i32
  }
  func.func @transform_1(%arg0: i32) -> (i32, i32) {
    %c0_i32 = arith.constant 0 : i32
    %c0_i32_0 = arith.constant 0 : i32
    %c0_i32_1 = arith.constant 0 : i32
    return %c0_i32, %c0_i32_0 : i32, i32
  }
  func.func @transform_2(%arg0: i32) -> (i32, i32) {
    %c0_i32 = arith.constant 0 : i32
    %c0_i32_0 = arith.constant 0 : i32
    %c0_i32_1 = arith.constant 0 : i32
    return %c0_i32, %c0_i32_0 : i32, i32
  }
  func.func @transform_3(%arg0: i32) -> (i32, i32) {
    %c0_i32 = arith.constant 0 : i32
    %c0_i32_0 = arith.constant 0 : i32
    %c0_i32_1 = arith.constant 0 : i32
    return %c0_i32, %c0_i32_0 : i32, i32
  }
  func.func @transform_4(%arg0: i32) -> (i32, i32) {
    %c0_i32 = arith.constant 0 : i32
    %c0_i32_0 = arith.constant 0 : i32
    %c0_i32_1 = arith.constant 0 : i32
    return %c0_i32, %c0_i32_0 : i32, i32
  }
  func.func @transform_5(%arg0: i32) -> (i32, i32) {
    %c0_i32 = arith.constant 0 : i32
    %c0_i32_0 = arith.constant 0 : i32
    %c0_i32_1 = arith.constant 0 : i32
    return %c0_i32, %c0_i32_0 : i32, i32
  }
  func.func @transform_6(%arg0: i32) -> (i32, i32) {
    %c0_i32 = arith.constant 0 : i32
    %c0_i32_0 = arith.constant 0 : i32
    %c0_i32_1 = arith.constant 0 : i32
    return %c0_i32, %c0_i32_0 : i32, i32
  }
  func.func @transform_7(%arg0: i32) -> (i32, i32) {
    %c0_i32 = arith.constant 0 : i32
    %c0_i32_0 = arith.constant 0 : i32
    %c0_i32_1 = arith.constant 0 : i32
    return %c0_i32, %c0_i32_0 : i32, i32
  }
  func.func @transform_8(%arg0: i32) -> (i32, i32, i32) {
    %c0_i32 = arith.constant 0 : i32
    %c0_i32_0 = arith.constant 0 : i32
    %c0_i32_1 = arith.constant 0 : i32
    return %arg0, %c0_i32, %c0_i32_0 : i32, i32, i32
  }
}

</mosaic_0001>

<bundles_post_ra>
// kernel: tpu_custom_call.1
= control target key start
LH: loop header
LB: loop body
LE: loop exit
PB: predicated region body
PF: predicated region fallthrough
CT: control target
= control target key end

     0   :  { %vm88_vm0 = vcmask 64512   ;;  %v1815_v3 = vmov 0.0   ;;  %v1816_v4 = vmov 4   ;;  %v3715_v6 = vmov 0   ;;  %s3706_s0 = inlined_call_operand.vmem [shape: f32[1,8,256], index: 0, kind: input, shape index: {}]   ;;  %s3707_s1 = inlined_call_operand.vmem [shape: f32[64,8], index: 1, kind: input, shape index: {}]   ;;  %s3708_s2 = inlined_call_operand.vmem [shape: f32[64,1], index: 2, kind: input, shape index: {}]   ;;  %s3709_s3 = inlined_call_operand.vmem [shape: f32[64,9], index: 3, kind: input, shape index: {}]   ;;  %s3710_s4 = inlined_call_operand.vmem [shape: f32[64,1], index: 4, kind: input, shape index: {}]   ;;  %s3711_s5 = inlined_call_operand.vmem [shape: f32[8,64], index: 5, kind: input, shape index: {}]   ;;  %s3712_s6 = inlined_call_operand.vmem [shape: f32[8,1], index: 6, kind: input, shape index: {}]   ;;  %s3713_s7 = inlined_call_operand.vmem [shape: f32[9,256], index: 7, kind: input, shape index: {}]   ;;  %s3714_s8 = inlined_call_operand.hbm [shape: f32[1,8,256], index: 8, kind: output, shape index: {}]  }
   0x1   :  { %v31_v0 = vld [vmem:[%s3706_s0 + $0x8] sm:$0xff]  ;;  %v30_v1 = vld [vmem:[%s3706_s0] sm:$0xff]  ;;  %177 = vmatprep.mubr.f32.mxu0 %v1815_v3  ;;  %1729 = vset.pattern.permute.xlu0 %v1816_v4  ;;  %v1902_v8 = vld [vmem:[%s3709_s3 + $0x18] sm:$0xff] }
   0x2   :  { %v32_v2 = vld [vmem:[%s3707_s1] sm:$0xff]  ;;  %143 = vmatprep.subr.mxu0 %v31_v0  ;;  %1728 = vset.pattern.permute.xlu1 %v3715_v6  ;;  %v33_v7 = vld [vmem:[%s3707_s1 + $0x8] sm:$0xff]  ;;  %v42_v9 = vld [vmem:[%s3708_s2 + $0x10] sm:$0xff] }
   0x3   :  { %144 = vmatpush1.msra.mxu0 %v30_v1  ;;  %v1892_v5 = vld [vmem:[%s3709_s3] sm:$0xff]  ;;  %1675 = vmatprep.mubr.f32.mxu1 %v1815_v3  ;;  %v34_v10 = vld [vmem:[%s3707_s1 + $0x10] sm:$0xff]  ;;  %v43_v11 = vld [vmem:[%s3708_s2 + $0x18] sm:$0xff] }
   0x4   :  { %1698 = vmatmul.mubr.msk.f32.vlgmr.msra.gmra.mxu0 %vm88_vm0, %v32_v2  ;;  %240 = vperm.xlu0 %1729, %v1892_v5  }
   0x5   :  { %183 = vmatprep.mubr.f32.mxu0 %v1815_v3  ;;  %60 = vperm.xlu1 %1728, %v42_v9  }
   0x8   :  { %1699 = vmatmul.mubr.msk.f32.gmra.mxu0 %vm88_vm0, %v33_v7  ;;  %255 = vperm.xlu0 %1729, %v1902_v8  }
   0x9   :  { %189 = vmatprep.mubr.f32.mxu0 %v1815_v3 }
   0xa   :  { %13 = vsyncpa [#allocation3], 0  ;;  %v1918_v12 = vld [vmem:[%s3709_s3 + $0x28] sm:$0xff]  ;;  %65 = vperm.xlu1 %1728, %v43_v11   ;;  %v35_v13 = vld [vmem:[%s3707_s1 + $0x18] sm:$0xff]  ;;  %v1818_v29 = vmov 1   ;;  %v1819_v30 = vmov 2  }
   0xb   :  { %v45_v14 = vld [vmem:[%s3708_s2 + $0x28] sm:$0xff]  ;;  %v1931_v15 = vld [vmem:[%s3709_s3 + $0x38] sm:$0xff]  ;;  %v36_v16 = vld [vmem:[%s3707_s1 + $0x20] sm:$0xff]  ;;  %v3719_v31 = vmov 3   ;;  %s1823_s11 = smov 1   ;;  %s1824_s12 = smov 15  }
   0xc   :  { %1700 = vmatmul.mubr.msk.f32.gmra.mxu0 %vm88_vm0, %v34_v10  ;;  %265 = vperm.xlu0 %1729, %v1918_v12   ;;  %v47_v17 = vld [vmem:[%s3708_s2 + $0x38] sm:$0xff]  ;;  %v40_v18 = vld [vmem:[%s3708_s2] sm:$0xff]  ;;  %v37_v19 = vld [vmem:[%s3707_s1 + $0x28] sm:$0xff]  ;;  %v3717_v46 = vmov 5   ;;  %s1826_s0 = smov 127   ;;  %s1827_s13 = smov 113  }
   0xd   :  { %195 = vmatprep.mubr.f32.mxu0 %v1815_v3  ;;  %v41_v20 = vld [vmem:[%s3708_s2 + $0x8] sm:$0xff]  ;;  %v38_v22 = vld [vmem:[%s3707_s1 + $0x30] sm:$0xff]  ;;  %v44_v24 = vld [vmem:[%s3708_s2 + $0x20] sm:$0xff]  ;;  %s1831_s14 = smov 112   ;;  %s1832_s15 = smov 111   ;;  %vm1607_vm9 = vcmask 523264  }
   0xe   :  { %75 = vperm.xlu1 %1728, %v45_v14   ;;  %v1956_v21 = vld [vmem:[%s3709_s3 + $0x8] sm:$0xff]  ;;  %v1965_v23 = vld [vmem:[%s3709_s3 + $0x10] sm:$0xff]  ;;  %v39_v25 = vld [vmem:[%s3707_s1 + $0x38] sm:$0xff]  ;;  %s1821_s1 = smov 16   ;;  %s1833_s17 = smov [#allocation2]  }
   0xf   :  { %v46_v26 = vld [vmem:[%s3708_s2 + $0x30] sm:$0xff]  ;;  %v1982_v27 = vld [vmem:[%s3709_s3 + $0x20] sm:$0xff]  ;;  %s1822_s2 = smov 17   ;;  %s1690_s18 = sshll.u32 %s1833_s17, 4  ;;  %s1691_s18 = int_to_ptr.vmem [resolvable:$true] %s1690_s18 }
  0x10   :  { %1701 = vmatmul.mubr.msk.f32.gmra.mxu0 %vm88_vm0, %v35_v13  ;;  %275 = vperm.xlu0 %1729, %v1931_v15   ;;  %v1988_v28 = vld [vmem:[%s3709_s3 + $0x30] sm:$0xff]  ;;  %s1793_s19 = scalar_lea.vmem %s1691_s18, 256  ;;  %p1798_p1 = scmp.lt.s32.totalorder %s1691_s18, %s1691_s18 }
  0x11   :  { %201 = vmatprep.mubr.f32.mxu0 %v1815_v3  ;;  %p1794_p0 = scmp.ne.s32.totalorder %s1691_s18, %s1793_s19  ;;  %p1799_p2 = scmp.lt.s32.totalorder %s1793_s19, %s1793_s19 }
  0x12   :  { %85 = vperm.xlu1 %1728, %v47_v17  }
  0x13   :  { %p1800_p3 = por %p1799_p2, %p1798_p1 }
  0x14   :  { %1702 = vmatmul.mubr.msk.f32.gmra.mxu0 %vm88_vm0, %v36_v16  ;;  %1731 = vset.pattern.permute.xlu0 %v3715_v6 }
  0x15   :  { %207 = vmatprep.mubr.f32.mxu0 %v1815_v3  ;;  %50 = vperm.xlu0 %1731, %v40_v18   ;;  %p1801_p4 = pnand %p1800_p3, %p1794_p0 }
  0x16   :  { %1730 = vset.pattern.permute.xlu1 %v1816_v4 }
  0x17   :  { %245 = vperm.xlu1 %1730, %v1956_v21  }
  0x18   :  { %1703 = vmatmul.mubr.msk.f32.gmra.mxu0 %vm88_vm0, %v37_v19 }
  0x19   :  { %213 = vmatprep.mubr.f32.mxu0 %v1815_v3  ;;  %55 = vperm.xlu0 %1731, %v41_v20  }
  0x1b   :  { %250 = vperm.xlu1 %1730, %v1965_v23  }
  0x1c   :  { %1704 = vmatmul.mubr.msk.f32.gmra.mxu0 %vm88_vm0, %v38_v22 }
  0x1d   :  { %219 = vmatprep.mubr.f32.mxu0 %v1815_v3  ;;  %70 = vperm.xlu0 %1731, %v44_v24  }
  0x1f   :  { %260 = vperm.xlu1 %1730, %v1982_v27  }
  0x20   :  { %1705 = vmatmul.mubr.msk.f32.gmra.mxu0 %vm88_vm0, %v39_v25 }
  0x21   :  { %80 = vperm.xlu0 %1731, %v46_v26  }
  0x23   :  { %270 = vperm.xlu1 %1730, %v1988_v28  }
  0x25   :  { %374 = vperm.xlu0 %1731, %v1956_v21  }
  0x27   :  { %1732 = vset.pattern.permute.xlu1 %v3715_v6 }
  0x28   :  { %370 = vperm.xlu1 %1732, %v1892_v5  }
  0x29   :  { %386 = vperm.xlu0 %1731, %v1982_v27  }
  0x2c   :  { %378 = vperm.xlu1 %1732, %v1965_v23  }
  0x2d   :  { %394 = vperm.xlu0 %1731, %v1988_v28  }
  0x30   :  { %382 = vperm.xlu1 %1732, %v1902_v8  }
  0x31   :  { %1733 = vset.pattern.permute.xlu0 %v1818_v29 }
  0x32   :  { %507 = vperm.xlu0 %1733, %v1892_v5  }
  0x34   :  { %390 = vperm.xlu1 %1732, %v1918_v12  }
  0x36   :  { %519 = vperm.xlu0 %1733, %v1902_v8  }
  0x38   :  { %398 = vperm.xlu1 %1732, %v1931_v15  }
  0x3a   :  { %527 = vperm.xlu0 %1733, %v1918_v12  }
  0x3c   :  { %1734 = vset.pattern.permute.xlu1 %v1818_v29 }
  0x3d   :  { %511 = vperm.xlu1 %1734, %v1956_v21  }
  0x3e   :  { %535 = vperm.xlu0 %1733, %v1931_v15  }
  0x41   :  { %515 = vperm.xlu1 %1734, %v1965_v23  }
  0x42   :  { %1736 = vset.pattern.permute.xlu0 %v1819_v30 }
  0x43   :  { %648 = vperm.xlu0 %1736, %v1956_v21  }
  0x45   :  { %523 = vperm.xlu1 %1734, %v1982_v27  }
  0x47   :  { %660 = vperm.xlu0 %1736, %v1982_v27  }
  0x49   :  { %531 = vperm.xlu1 %1734, %v1988_v28  }
  0x4b   :  { %668 = vperm.xlu0 %1736, %v1988_v28  }
  0x4d   :  { %1735 = vset.pattern.permute.xlu1 %v1819_v30 }
  0x4e   :  { %644 = vperm.xlu1 %1735, %v1892_v5  }
  0x4f   :  { %1737 = vset.pattern.permute.xlu0 %v3719_v31 }
  0x50   :  { %781 = vperm.xlu0 %1737, %v1892_v5  }
  0x52   :  { %652 = vperm.xlu1 %1735, %v1965_v23  }
  0x56   :  { %656 = vperm.xlu1 %1735, %v1902_v8  }
  0x5a   :  { %664 = vperm.xlu1 %1735, %v1918_v12  }
  0x5e   :  { %672 = vperm.xlu1 %1735, %v1931_v15  }
  0x62   :  { %1738 = vset.pattern.permute.xlu1 %v3719_v31 }
  0x63   :  { %809 = vperm.xlu1 %1738, %v1931_v15  }
  0x67   :  { %805 = vperm.xlu1 %1738, %v1988_v28  }
  0x6b   :  { %801 = vperm.xlu1 %1738, %v1918_v12  }
  0x6f   :  { %1739 = vset.pattern.permute.xlu1 %v3717_v46 }
  0x7f   :  { %v2022_v32 = vpop.permute.xlu0 %240 }
  0x80   :  { %3845 = vst [vmem:[#allocation5_spill] sm:$0xff] %v2022_v32  ;;  %v61_v33 = vpop.permute.xlu1 %60 }
  0x83   :  { %v2024_v34 = vpop.permute.xlu0 %255 }
  0x84   :  { %3846 = vst [vmem:[#allocation6_spill] sm:$0xff] %v2024_v34 }
  0x85   :  { %v2026_v35 = vpop.permute.xlu1 %65 }
  0x87   :  { %v2028_v36 = vpop.permute.xlu0 %265 }
  0x88   :  { %3847 = vst [vmem:[#allocation7_spill] sm:$0xff] %v2028_v36  ;;  %v2477_v36 = vld [vmem:[%s3713_s7] sm:$0xff] }
  0x89   :  { %v2030_v37 = vpop.permute.xlu1 %75 }
  0x8b   :  { %v2032_v38 = vpop.permute.xlu0 %275 }
  0x8d   :  { %v2034_v39 = vpop.permute.xlu1 %85 }
  0x90   :  { %v51_v40 = vpop.permute.xlu0 %50 }
  0x92   :  { %v2038_v43 = vpop.permute.xlu1 %245 }
  0x93   :  { %3849 = vst [vmem:[#allocation9_spill] sm:$0xff] %v2038_v43 }
  0x94   :  { %v56_v51 = vpop.permute.xlu0 %55 }
  0x96   :  { %v2044_v44 = vpop.permute.xlu1 %250 }
  0x97   :  { %3850 = vst [vmem:[#allocation10_spill] sm:$0xff] %v2044_v44 }
  0x98   :  { %v71_v62 = vpop.permute.xlu0 %70 }
  0x9a   :  { %v2057_v48 = vpop.permute.xlu1 %260 }
  0x9b   :  { %3852 = vst [vmem:[#allocation12_spill] sm:$0xff] %v2057_v48 }
  0x9c   :  { %v2111_v2 = vpop.permute.xlu0 %80 }
  0x9e   :  { %v2063_v50 = vpop.permute.xlu1 %270 }
  0xa0   :  { %v2126_v5 = vpop.permute.xlu0 %374 }
  0xa1   :  { %3863 = vst [vmem:[#allocation23_spill] sm:$0xff] %v2126_v5 }
  0xa3   :  { %v2071_v53 = vpop.permute.xlu1 %370 }
  0xa4   :  { %3854 = vst [vmem:[#allocation14_spill] sm:$0xff] %v2071_v53  ;;  %v2137_v11 = vpop.permute.xlu0 %386 }
  0xa5   :  { %3865 = vst [vmem:[#allocation25_spill] sm:$0xff] %v2137_v11 }
  0xa7   :  { %v2079_v56 = vpop.permute.xlu1 %378 }
  0xa8   :  { %3856 = vst [vmem:[#allocation16_spill] sm:$0xff] %v2079_v56  ;;  %v2149_v16 = vpop.permute.xlu0 %394 }
  0xab   :  { %v2089_v57 = vpop.permute.xlu1 %382 }
  0xac   :  { %3857 = vst [vmem:[#allocation17_spill] sm:$0xff] %v2089_v57 }
  0xad   :  { %v2159_v19 = vpop.permute.xlu0 %507 }
  0xae   :  { %3867 = vst [vmem:[#allocation27_spill] sm:$0xff] %v2159_v19 }
  0xaf   :  { %v2097_v60 = vpop.permute.xlu1 %390 }
  0xb0   :  { %3859 = vst [vmem:[#allocation19_spill] sm:$0xff] %v2097_v60 }
  0xb1   :  { %v2173_v25 = vpop.permute.xlu0 %519 }
  0xb2   :  { %3869 = vst [vmem:[#allocation29_spill] sm:$0xff] %v2173_v25  ;;  %v2482_v25 = vld [vmem:[%s3713_s7 + $0x8] sm:$0xff] }
  0xb3   :  { %v2109_v0 = vpop.permute.xlu1 %398 }
  0xb8   :  { %v2117_v3 = vpop.permute.xlu1 %511 }
  0xb9   :  { %3861 = vst [vmem:[#allocation21_spill] sm:$0xff] %v2117_v3 }
  0xbc   :  { %v2128_v7 = vpop.permute.xlu1 %515 }
  0xbd   :  { %3864 = vst [vmem:[#allocation24_spill] sm:$0xff] %v2128_v7 }
  0xc0   :  { %v2143_v13 = vpop.permute.xlu1 %523 }
  0xc1   :  { %3866 = vst [vmem:[#allocation26_spill] sm:$0xff] %v2143_v13 }
  0xc4   :  { %v179_v41 = vpop.f32.mrf.mxu0  ;;  %v2153_v18 = vpop.permute.xlu1 %531 }
  0xc5   :  { %v2036_v42 = vadd.f32 %v179_v41, %v51_v40 }
  0xc6   :  { %v181_v45 = vpop.f32.mrf.mxu0 }
  0xc7   :  { %3848 = vst [vmem:[#allocation8_spill] sm:$0xff] %v2036_v42  ;;  %433 = vrot.lane.b32.xlu0 %v2036_v42, %s1821_s1  ;;  %294 = vrot.lane.b32.xlu1 %v2036_v42, %s1822_s2  ;;  %v2051_v47 = vadd.f32 %v181_v45, %v51_v40 }
  0xc8   :  { %v185_v49 = vpop.f32.mrf.mxu0 }
  0xc9   :  { %3851 = vst [vmem:[#allocation11_spill] sm:$0xff] %v2051_v47  ;;  %v2065_v52 = vadd.f32 %v185_v49, %v56_v51  ;;  %v2165_v22 = vpop.permute.xlu1 %644 }
  0xca   :  { %v187_v54 = vpop.f32.mrf.mxu0  ;;  %3868 = vst [vmem:[#allocation28_spill] sm:$0xff] %v2165_v22 }
  0xcb   :  { %707 = vrot.lane.b32.xlu0 %v2036_v42, %s1823_s11  ;;  %570 = vrot.lane.b32.xlu1 %v2036_v42, %s1824_s12  ;;  %3853 = vst [vmem:[#allocation13_spill] sm:$0xff] %v2065_v52  ;;  %v2077_v55 = vadd.f32 %v187_v54, %v56_v51 }
  0xcc   :  { %v191_v58 = vpop.f32.mrf.mxu0 }
  0xcd   :  { %3855 = vst [vmem:[#allocation15_spill] sm:$0xff] %v2077_v55  ;;  %v2091_v59 = vadd.f32 %v191_v58, %v61_v33  ;;  %v2175_v26 = vpop.permute.xlu1 %652 }
  0xce   :  { %v193_v61 = vpop.f32.mrf.mxu0  ;;  %3870 = vst [vmem:[#allocation30_spill] sm:$0xff] %v2175_v26 }
  0xcf   :  { %449 = vrot.lane.b32.xlu0 %v2051_v47, %s1821_s1  ;;  %310 = vrot.lane.b32.xlu1 %v2051_v47, %s1822_s2  ;;  %3858 = vst [vmem:[#allocation18_spill] sm:$0xff] %v2091_v59  ;;  %v2103_v63 = vadd.f32 %v193_v61, %v61_v33  ;;  %v2184_v33 = vpop.permute.xlu0 %527 }
  0xd0   :  { %v197_v1 = vpop.f32.mrf.mxu0  ;;  %3871 = vst [vmem:[#allocation31_spill] sm:$0xff] %v2184_v33 }
  0xd1   :  { %3860 = vst [vmem:[#allocation20_spill] sm:$0xff] %v2103_v63  ;;  %v2120_v4 = vadd.f32 %v197_v1, %v2026_v35 }
  0xd2   :  { %v199_v9 = vpop.f32.mrf.mxu0 }
  0xd3   :  { %723 = vrot.lane.b32.xlu0 %v2051_v47, %s1823_s11  ;;  %586 = vrot.lane.b32.xlu1 %v2051_v47, %s1824_s12  ;;  %3862 = vst [vmem:[#allocation22_spill] sm:$0xff] %v2120_v4  ;;  %v2135_v10 = vadd.f32 %v199_v9, %v2026_v35  ;;  %v2190_v35 = vpop.permute.xlu1 %656  ;;  %v2196_v41 = vpop.permute.xlu0 %535 }
  0xd4   :  { %v203_v14 = vpop.f32.mrf.mxu0  ;;  %3872 = vst [vmem:[#allocation32_spill] sm:$0xff] %v2190_v35 }
  0xd5   :  { %v2151_v17 = vadd.f32 %v203_v14, %v71_v62 }
  0xd6   :  { %v205_v20 = vpop.f32.mrf.mxu0 }
  0xd7   :  { %296 = vrot.lane.b32.xlu0 %v2065_v52, %s1822_s2  ;;  %435 = vrot.lane.b32.xlu1 %v2065_v52, %s1821_s1  ;;  %v2167_v24 = vadd.f32 %v205_v20, %v71_v62  ;;  %v2201_v49 = vpop.permute.xlu1 %664  ;;  %v2207_v51 = vpop.permute.xlu0 %648 }
  0xd8   :  { %v209_v29 = vpop.f32.mrf.mxu0  ;;  %3874 = vst [vmem:[#allocation34_spill] sm:$0xff] %v2201_v49  ;;  %3875 = vst [vmem:[#allocation35_spill] sm:$0xff] %v2207_v51 }
  0xd9   :  { %v2182_v30 = vadd.f32 %v209_v29, %v2030_v37 }
  0xda   :  { %v211_v40 = vpop.f32.mrf.mxu0 }
  0xdb   :  { %572 = vrot.lane.b32.xlu0 %v2065_v52, %s1824_s12  ;;  %709 = vrot.lane.b32.xlu1 %v2065_v52, %s1823_s11  ;;  %v2199_v45 = vadd.f32 %v211_v40, %v2030_v37  ;;  %v2209_v58 = vpop.permute.xlu1 %672  ;;  %v2224_v62 = vpop.permute.xlu0 %660 }
  0xdc   :  { %v215_v54 = vpop.f32.mrf.mxu0  ;;  %3876 = vst [vmem:[#allocation36_spill] sm:$0xff] %v2224_v62 }
  0xdd   :  { %3873 = vst [vmem:[#allocation33_spill] sm:$0xff] %v2199_v45  ;;  %v2216_v37 = vadd.f32 %v215_v54, %v2111_v2 }
  0xde   :  { %v217_v1 = vpop.f32.mrf.mxu0 }
  0xdf   :  { %312 = vrot.lane.b32.xlu0 %v2077_v55, %s1822_s2  ;;  %451 = vrot.lane.b32.xlu1 %v2077_v55, %s1821_s1  ;;  %v2222_v61 = vpop.permute.xlu1 %809  ;;  %v2231_v9 = vadd.f32 %v217_v1, %v2111_v2  ;;  %v2235_v20 = vpop.permute.xlu0 %668 }
  0xe0   :  { %v221_v29 = vpop.f32.mrf.mxu0 }
  0xe1   :  { %v2250_v54 = vadd.f32 %v221_v29, %v2034_v39 }
  0xe2   :  { %v223_v46 = vpop.f32.mrf.mxu0 }
  0xe3   :  { %588 = vrot.lane.b32.xlu0 %v2077_v55, %s1824_s12  ;;  %725 = vrot.lane.b32.xlu1 %v2077_v55, %s1823_s11  ;;  %v2233_v14 = vpop.permute.xlu1 %805  ;;  %v2247_v2 = vpop.permute.xlu0 %781  ;;  %v2265_v29 = vadd.f32 %v223_v46, %v2034_v39 }
  0xe4   :  { %3878 = vst [vmem:[#allocation38_spill] sm:$0xff] %v2247_v2 }
  0xe7   :  { %437 = vrot.lane.b32.xlu0 %v2091_v59, %s1821_s1  ;;  %298 = vrot.lane.b32.xlu1 %v2091_v59, %s1822_s2  ;;  %v2245_v40 = vpop.permute.xlu1 %801 }
  0xe8   :  { %3877 = vst [vmem:[#allocation37_spill] sm:$0xff] %v2245_v40 }
  0xeb   :  { %711 = vrot.lane.b32.xlu0 %v2091_v59, %s1823_s11  ;;  %574 = vrot.lane.b32.xlu1 %v2091_v59, %s1824_s12 }
  0xef   :  { %453 = vrot.lane.b32.xlu0 %v2103_v63, %s1821_s1  ;;  %314 = vrot.lane.b32.xlu1 %v2103_v63, %s1822_s2 }
  0xf3   :  { %727 = vrot.lane.b32.xlu0 %v2103_v63, %s1823_s11  ;;  %590 = vrot.lane.b32.xlu1 %v2103_v63, %s1824_s12 }
  0xf7   :  { %300 = vrot.lane.b32.xlu0 %v2120_v4, %s1822_s2  ;;  %439 = vrot.lane.b32.xlu1 %v2120_v4, %s1821_s1 }
  0xfb   :  { %576 = vrot.lane.b32.xlu0 %v2120_v4, %s1824_s12  ;;  %713 = vrot.lane.b32.xlu1 %v2120_v4, %s1823_s11 }
  0xff   :  { %316 = vrot.lane.b32.xlu0 %v2135_v10, %s1822_s2  ;;  %455 = vrot.lane.b32.xlu1 %v2135_v10, %s1821_s1 }
 0x103   :  { %592 = vrot.lane.b32.xlu0 %v2135_v10, %s1824_s12  ;;  %729 = vrot.lane.b32.xlu1 %v2135_v10, %s1823_s11 }
 0x107   :  { %441 = vrot.lane.b32.xlu0 %v2151_v17, %s1821_s1  ;;  %302 = vrot.lane.b32.xlu1 %v2151_v17, %s1822_s2 }
 0x10b   :  { %715 = vrot.lane.b32.xlu0 %v2151_v17, %s1823_s11  ;;  %578 = vrot.lane.b32.xlu1 %v2151_v17, %s1824_s12 }
 0x10f   :  { %457 = vrot.lane.b32.xlu0 %v2167_v24, %s1821_s1  ;;  %318 = vrot.lane.b32.xlu1 %v2167_v24, %s1822_s2 }
 0x113   :  { %731 = vrot.lane.b32.xlu0 %v2167_v24, %s1823_s11  ;;  %594 = vrot.lane.b32.xlu1 %v2167_v24, %s1824_s12 }
 0x117   :  { %304 = vrot.lane.b32.xlu0 %v2182_v30, %s1822_s2  ;;  %443 = vrot.lane.b32.xlu1 %v2182_v30, %s1821_s1 }
 0x11b   :  { %580 = vrot.lane.b32.xlu0 %v2182_v30, %s1824_s12  ;;  %717 = vrot.lane.b32.xlu1 %v2182_v30, %s1823_s11 }
 0x11f   :  { %320 = vrot.lane.b32.xlu0 %v2199_v45, %s1822_s2  ;;  %459 = vrot.lane.b32.xlu1 %v2199_v45, %s1821_s1 }
 0x123   :  { %596 = vrot.lane.b32.xlu0 %v2199_v45, %s1824_s12  ;;  %733 = vrot.lane.b32.xlu1 %v2199_v45, %s1823_s11 }
 0x127   :  { %445 = vrot.lane.b32.xlu0 %v2216_v37, %s1821_s1  ;;  %306 = vrot.lane.b32.xlu1 %v2216_v37, %s1822_s2 }
 0x12b   :  { %719 = vrot.lane.b32.xlu0 %v2216_v37, %s1823_s11  ;;  %582 = vrot.lane.b32.xlu1 %v2216_v37, %s1824_s12 }
 0x12f   :  { %461 = vrot.lane.b32.xlu0 %v2231_v9, %s1821_s1  ;;  %322 = vrot.lane.b32.xlu1 %v2231_v9, %s1822_s2 }
 0x133   :  { %735 = vrot.lane.b32.xlu0 %v2231_v9, %s1823_s11  ;;  %598 = vrot.lane.b32.xlu1 %v2231_v9, %s1824_s12 }
 0x137   :  { %308 = vrot.lane.b32.xlu0 %v2250_v54, %s1822_s2  ;;  %447 = vrot.lane.b32.xlu1 %v2250_v54, %s1821_s1 }
 0x139   :  { %v2256_v1 = vpop.permute.xlu0 %433  ;;  %v2258_v6 = vpop.permute.xlu1 %294 }
 0x13a   :  { %3879 = vst [vmem:[#allocation39_spill] sm:$0xff] %v2256_v1  ;;  %3880 = vst [vmem:[#allocation40_spill] sm:$0xff] %v2258_v6 }
 0x13b   :  { %584 = vrot.lane.b32.xlu0 %v2250_v54, %s1824_s12  ;;  %721 = vrot.lane.b32.xlu1 %v2250_v54, %s1823_s11 }
 0x13d   :  { %v2267_v31 = vpop.permute.xlu0 %707  ;;  %v2269_v2 = vpop.permute.xlu1 %570 }
 0x13e   :  { %3881 = vst [vmem:[#allocation41_spill] sm:$0xff] %v2267_v31  ;;  %3882 = vst [vmem:[#allocation42_spill] sm:$0xff] %v2269_v2 }
 0x13f   :  { %324 = vrot.lane.b32.xlu0 %v2265_v29, %s1822_s2  ;;  %858 = vrot.lane.b32.xlu1 %v2250_v54, %s1826_s0 }
 0x141   :  { %v2275_v22 = vpop.permute.xlu0 %449  ;;  %v2277_v19 = vpop.permute.xlu1 %310 }
 0x142   :  { %3883 = vst [vmem:[#allocation43_spill] sm:$0xff] %v2275_v22  ;;  %3884 = vst [vmem:[#allocation44_spill] sm:$0xff] %v2277_v19  ;;  %v3896_v19 = vmov 5  }
 0x143   :  { %600 = vrot.lane.b32.xlu0 %v2265_v29, %s1824_s12  ;;  %463 = vrot.lane.b32.xlu1 %v2265_v29, %s1821_s1 }
 0x145   :  { %v2283_v39 = vpop.permute.xlu0 %723  ;;  %v2285_v46 = vpop.permute.xlu1 %586 }
 0x146   :  { %3885 = vst [vmem:[#allocation45_spill] sm:$0xff] %v2283_v39  ;;  %3886 = vst [vmem:[#allocation46_spill] sm:$0xff] %v2285_v46  ;;  %v3891_v46 = vmov 3  }
 0x147   :  { %872 = vrot.lane.b32.xlu0 %v2231_v9, %s1826_s0  ;;  %737 = vrot.lane.b32.xlu1 %v2265_v29, %s1823_s11 }
 0x149   :  { %v2291_v31 = vpop.permute.xlu0 %296  ;;  %v2293_v2 = vpop.permute.xlu1 %435 }
 0x14a   :  { %3887 = vst [vmem:[#allocation47_spill] sm:$0xff] %v2291_v31  ;;  %3888 = vst [vmem:[#allocation48_spill] sm:$0xff] %v2293_v2 }
 0x14b   :  { %874 = vrot.lane.b32.xlu0 %v2265_v29, %s1826_s0  ;;  %942 = vperm.xlu1 %1739, %v1988_v28  }
 0x14d   :  { %v2298_v32 = vpop.permute.xlu0 %572  ;;  %v2300_v39 = vpop.permute.xlu1 %709 }
 0x14e   :  { %3889 = vst [vmem:[#allocation49_spill] sm:$0xff] %v2298_v32  ;;  %3890 = vst [vmem:[#allocation50_spill] sm:$0xff] %v2300_v39  ;;  %v3744_v39 = vmov 7  }
 0x14f   :  { %995 = vrot.lane.b32.xlu0 %v2250_v54, %s1827_s13  ;;  %1740 = vset.pattern.permute.xlu1 %v3891_v46 }
 0x150   :  { %797 = vperm.xlu1 %1740, %v1982_v27  }
 0x151   :  { %v2306_v53 = vpop.permute.xlu0 %312  ;;  %v2308_v22 = vpop.permute.xlu1 %451 }
 0x152   :  { %3892 = vst [vmem:[#allocation51_spill] sm:$0xff] %v2306_v53  ;;  %3893 = vst [vmem:[#allocation52_spill] sm:$0xff] %v2308_v22 }
 0x153   :  { %793 = vperm.xlu0 %1737, %v1902_v8  }
 0x154   :  { %856 = vrot.lane.b32.xlu1 %v2216_v37, %s1826_s0 }
 0x155   :  { %v2313_v1 = vpop.permute.xlu0 %588  ;;  %v2315_v6 = vpop.permute.xlu1 %725  ;;  %1741 = vset.pattern.permute.xlu1 %v3896_v19 }
 0x156   :  { %3894 = vst [vmem:[#allocation53_spill] sm:$0xff] %v2313_v1  ;;  %3895 = vst [vmem:[#allocation54_spill] sm:$0xff] %v2315_v6  ;;  %v3749_v6 = vmov 8  }
 0x157   :  { %1743 = vset.pattern.permute.xlu0 %v3896_v19 }
 0x158   :  { %946 = vperm.xlu0 %1743, %v1931_v15   ;;  %938 = vperm.xlu1 %1741, %v1918_v12  }
 0x159   :  { %v2321_v26 = vpop.permute.xlu0 %437  ;;  %v2323_v7 = vpop.permute.xlu1 %298 }
 0x15a   :  { %3897 = vst [vmem:[#allocation55_spill] sm:$0xff] %v2321_v26  ;;  %3898 = vst [vmem:[#allocation56_spill] sm:$0xff] %v2323_v7 }
 0x15c   :  { %934 = vperm.xlu0 %1743, %v1982_v27   ;;  %1011 = vrot.lane.b32.xlu1 %v2265_v29, %s1827_s13 }
 0x15d   :  { %v2328_v56 = vpop.permute.xlu0 %711  ;;  %v2330_v51 = vpop.permute.xlu1 %574  ;;  %1742 = vset.pattern.permute.xlu1 %v3744_v39  ;;  %v3750_v39 = vmov 6  }
 0x15e   :  { %3899 = vst [vmem:[#allocation57_spill] sm:$0xff] %v2328_v56  ;;  %3900 = vst [vmem:[#allocation58_spill] sm:$0xff] %v2330_v51 }
 0x160   :  { %852 = vrot.lane.b32.xlu0 %v2151_v17, %s1826_s0  ;;  %1220 = vperm.xlu1 %1742, %v1931_v15  }
 0x161   :  { %v2336_v26 = vpop.permute.xlu0 %453  ;;  %v2338_v7 = vpop.permute.xlu1 %314 }
 0x162   :  { %3901 = vst [vmem:[#allocation59_spill] sm:$0xff] %v2336_v26  ;;  %3902 = vst [vmem:[#allocation60_spill] sm:$0xff] %v2338_v7 }
 0x164   :  { %930 = vperm.xlu0 %1743, %v1902_v8   ;;  %854 = vrot.lane.b32.xlu1 %v2182_v30, %s1826_s0 }
 0x165   :  { %v2343_v56 = vpop.permute.xlu0 %727  ;;  %v2345_v51 = vpop.permute.xlu1 %590  ;;  %1744 = vset.pattern.permute.xlu1 %v3749_v6 }
 0x166   :  { %3903 = vst [vmem:[#allocation61_spill] sm:$0xff] %v2343_v56  ;;  %3904 = vst [vmem:[#allocation62_spill] sm:$0xff] %v2345_v51 }
 0x168   :  { %1746 = vset.pattern.permute.xlu0 %v3750_v39  ;;  %870 = vrot.lane.b32.xlu1 %v2199_v45, %s1826_s0 }
 0x169   :  { %1083 = vperm.xlu0 %1746, %v1931_v15   ;;  %v2352_v26 = vpop.permute.xlu0 %300  ;;  %v2354_v7 = vpop.permute.xlu1 %439 }
 0x16a   :  { %3905 = vst [vmem:[#allocation63_spill] sm:$0xff] %v2352_v26  ;;  %3906 = vst [vmem:[#allocation64_spill] sm:$0xff] %v2354_v7 }
 0x16c   :  { %993 = vrot.lane.b32.xlu1 %v2216_v37, %s1827_s13 }
 0x16d   :  { %1079 = vperm.xlu0 %1746, %v1988_v28   ;;  %v2359_v56 = vpop.permute.xlu0 %576  ;;  %v2361_v6 = vpop.permute.xlu1 %713 }
 0x16e   :  { %3907 = vst [vmem:[#allocation65_spill] sm:$0xff] %v2359_v56  ;;  %3908 = vst [vmem:[#allocation66_spill] sm:$0xff] %v2361_v6 }
 0x170   :  { %1009 = vrot.lane.b32.xlu1 %v2231_v9, %s1827_s13 }
 0x171   :  { %1075 = vperm.xlu0 %1746, %v1918_v12   ;;  %v2366_v39 = vpop.permute.xlu0 %316  ;;  %v2368_v51 = vpop.permute.xlu1 %455 }
 0x172   :  { %3909 = vst [vmem:[#allocation67_spill] sm:$0xff] %v2366_v39  ;;  %3910 = vst [vmem:[#allocation68_spill] sm:$0xff] %v2368_v51 }
 0x174   :  { %1132 = vrot.lane.b32.xlu1 %v2250_v54, %s1831_s14 }
 0x175   :  { %v2372_v3 = vpop.permute.xlu0 %592  ;;  %v2374_v44 = vpop.permute.xlu1 %729  ;;  %1071 = vperm.xlu0 %1746, %v1982_v27  }
 0x176   :  { %3911 = vst [vmem:[#allocation69_spill] sm:$0xff] %v2372_v3  ;;  %3912 = vst [vmem:[#allocation70_spill] sm:$0xff] %v2374_v44 }
 0x178   :  { %1148 = vrot.lane.b32.xlu1 %v2265_v29, %s1831_s14 }
 0x179   :  { %v2379_v43 = vpop.permute.xlu0 %441  ;;  %v2381_v1 = vpop.permute.xlu1 %302  ;;  %866 = vrot.lane.b32.xlu0 %v2135_v10, %s1826_s0 }
 0x17a   :  { %3913 = vst [vmem:[#allocation71_spill] sm:$0xff] %v2379_v43  ;;  %3914 = vst [vmem:[#allocation72_spill] sm:$0xff] %v2381_v1 }
 0x17c   :  { %1357 = vperm.xlu1 %1744, %v1931_v15  }
 0x17d   :  { %v2386_v32 = vpop.permute.xlu0 %715  ;;  %v2388_v5 = vpop.permute.xlu1 %578  ;;  %989 = vrot.lane.b32.xlu0 %v2151_v17, %s1827_s13 }
 0x17e   :  { %3915 = vst [vmem:[#allocation73_spill] sm:$0xff] %v2386_v32  ;;  %3916 = vst [vmem:[#allocation74_spill] sm:$0xff] %v2388_v5 }
 0x180   :  { %1745 = vset.pattern.permute.xlu1 %v3891_v46 }
 0x181   :  { %v2393_v2 = vpop.permute.xlu0 %457  ;;  %v2395_v22 = vpop.permute.xlu1 %318  ;;  %1067 = vperm.xlu0 %1746, %v1902_v8   ;;  %789 = vperm.xlu1 %1745, %v1965_v23  }
 0x182   :  { %3917 = vst [vmem:[#allocation75_spill] sm:$0xff] %v2393_v2  ;;  %3918 = vst [vmem:[#allocation76_spill] sm:$0xff] %v2395_v22 }
 0x185   :  { %v2399_v53 = vpop.permute.xlu0 %731  ;;  %v2401_v15 = vpop.permute.xlu1 %594  ;;  %864 = vrot.lane.b32.xlu0 %v2103_v63, %s1826_s0  ;;  %868 = vrot.lane.b32.xlu1 %v2167_v24, %s1826_s0 }
 0x186   :  { %3919 = vst [vmem:[#allocation77_spill] sm:$0xff] %v2399_v53  ;;  %3920 = vst [vmem:[#allocation78_spill] sm:$0xff] %v2401_v15  ;;  %v326_v53 = vlaneseq }
 0x188   :  { %v2469_v35 = vand.u32 127, %v326_v53 }
 0x189   :  { %v2407_v31 = vpop.permute.xlu0 %304  ;;  %v2409_v46 = vpop.permute.xlu1 %443  ;;  %987 = vrot.lane.b32.xlu0 %v2120_v4, %s1827_s13  ;;  %991 = vrot.lane.b32.xlu1 %v2182_v30, %s1827_s13 }
 0x18a   :  { %3921 = vst [vmem:[#allocation79_spill] sm:$0xff] %v2407_v31  ;;  %3922 = vst [vmem:[#allocation80_spill] sm:$0xff] %v2409_v46  ;;  %vm328_vm1 = vcmp.lt.s32.totalorder %v2469_v35, 17  ;;  %vm465_vm2 = vcmp.lt.s32.totalorder %v2469_v35, 16  ;;  %vm602_vm3 = vcmp.lt.s32.totalorder %v2469_v35, 15  ;;  %vm739_vm4 = vcmp.lt.s32.totalorder %v2469_v35, 1 }
 0x18b   :  { %vm876_vm5 = vcmp.lt.s32.totalorder %v2469_v35, 127  ;;  %vm1013_vm6 = vcmp.lt.s32.totalorder %v2469_v35, 113  ;;  %vm1150_vm7 = vcmp.lt.s32.totalorder %v2469_v35, 112  ;;  %vm1287_vm8 = vcmp.lt.s32.totalorder %v2469_v35, 111 }
 0x18d   :  { %v2415_v40 = vpop.permute.xlu0 %580  ;;  %v2417_v49 = vpop.permute.xlu1 %717  ;;  %1063 = vperm.xlu0 %1746, %v1965_v23   ;;  %1007 = vrot.lane.b32.xlu1 %v2199_v45, %s1827_s13 }
 0x18e   :  { %3923 = vst [vmem:[#allocation81_spill] sm:$0xff] %v2415_v40  ;;  %3924 = vst [vmem:[#allocation82_spill] sm:$0xff] %v2417_v49 }
 0x191   :  { %v2422_v33 = vpop.permute.xlu0 %320  ;;  %v2424_v60 = vpop.permute.xlu1 %459  ;;  %862 = vrot.lane.b32.xlu0 %v2077_v55, %s1826_s0  ;;  %1130 = vrot.lane.b32.xlu1 %v2216_v37, %s1831_s14 }
 0x192   :  { %3925 = vst [vmem:[#allocation83_spill] sm:$0xff] %v2422_v33  ;;  %3926 = vst [vmem:[#allocation84_spill] sm:$0xff] %v2424_v60 }
 0x195   :  { %v2430_v62 = vpop.permute.xlu0 %596  ;;  %v2432_v40 = vpop.permute.xlu1 %733  ;;  %985 = vrot.lane.b32.xlu0 %v2091_v59, %s1827_s13  ;;  %1146 = vrot.lane.b32.xlu1 %v2231_v9, %s1831_s14 }
 0x196   :  { %3927 = vst [vmem:[#allocation85_spill] sm:$0xff] %v2430_v62  ;;  %3928 = vst [vmem:[#allocation86_spill] sm:$0xff] %v2432_v40  ;;  %v3929_v40 = vmov 7  }
 0x199   :  { %v2438_v49 = vpop.permute.xlu0 %445  ;;  %v2440_v13 = vpop.permute.xlu1 %306  ;;  %1059 = vperm.xlu0 %1746, %v1956_v21   ;;  %1269 = vrot.lane.b32.xlu1 %v2250_v54, %s1832_s15 }
 0x19d   :  { %v2445_v46 = vpop.permute.xlu0 %719  ;;  %v2447_v62 = vpop.permute.xlu1 %582  ;;  %1752 = vset.pattern.permute.xlu0 %v3929_v40  ;;  %1285 = vrot.lane.b32.xlu1 %v2265_v29, %s1832_s15  ;;  %v2465_v40 = vshrl.u32 %v326_v53, 7  ;;  %v3930_v53 = vmov 0  }
 0x19e   :  { %1216 = vperm.xlu0 %1752, %v1988_v28  }
 0x19f   :  { %v347_v11 = vsub.s32 0, %v2465_v40  ;;  %v484_v1 = vsub.s32 1, %v2465_v40  ;;  %v621_v48 = vsub.s32 2, %v2465_v40 }
 0x1a1   :  { %v2453_v60 = vpop.permute.xlu0 %461  ;;  %v323_v32 = vpop.permute.xlu1 %322  ;;  %785 = vperm.xlu1 %1745, %v1956_v21   ;;  %v2490_v6 = vrot.slane %v2477_v36, %v347_v11  ;;  %v2493_v44 = vrot.slane %v2482_v25, %v347_v11  ;;  %v2512_v7 = vrot.slane %v2477_v36, %v484_v1  ;;  %v2524_v39 = vrot.slane %v2477_v36, %v621_v48 }
 0x1a2   :  { %1212 = vperm.xlu0 %1752, %v1918_v12   ;;  %v2527_v26 = vrot.slane %v2482_v25, %v621_v48 }
 0x1a3   :  { %3931 = vst [vmem:[#allocation87_spill] sm:$0xff] %v2490_v6  ;;  %3932 = vst [vmem:[#allocation88_spill] sm:$0xff] %v2493_v44 }
 0x1a5   :  { %v2457_v31 = vpop.permute.xlu0 %735  ;;  %v2459_v33 = vpop.permute.xlu1 %598  ;;  %850 = vrot.lane.b32.xlu1 %v2120_v4, %s1826_s0 }
 0x1a6   :  { %1208 = vperm.xlu0 %1752, %v1982_v27   ;;  %1747 = vset.pattern.permute.xlu1 %v3896_v19 }
 0x1a9   :  { %v309_v5 = vpop.permute.xlu0 %308  ;;  %v448_v15 = vpop.permute.xlu1 %447  ;;  %926 = vperm.xlu1 %1747, %v1965_v23  }
 0x1aa   :  { %1204 = vperm.xlu0 %1752, %v1902_v8  }
 0x1ad   :  { %v585_v43 = vpop.permute.xlu0 %584  ;;  %v2472_v2 = vpop.permute.xlu1 %721  ;;  %1005 = vrot.lane.b32.xlu1 %v2167_v24, %s1827_s13 }
 0x1ae   :  { %1200 = vperm.xlu0 %1752, %v1965_v23   ;;  %1748 = vset.pattern.permute.xlu1 %v3930_v53 }
 0x1b1   :  { %v325_v56 = vpop.permute.xlu0 %324  ;;  %v2495_v3 = vpop.permute.xlu1 %858  ;;  %1128 = vrot.lane.b32.xlu1 %v2182_v30, %s1831_s14 }
 0x1b2   :  { %v336_v22 = vsel %vm328_vm1, %v309_v5, %v325_v56  ;;  %v344_v57 = vsel %vm328_vm1, %v325_v56, %v309_v5  ;;  %860 = vrot.lane.b32.xlu0 %v2051_v47, %s1826_s0  ;;  %v2515_v56 = vrot.slane %v2482_v25, %v484_v1 }
 0x1b3   :  { %v367_v34 = vmul.f32 %v2490_v6, %v344_v57  ;;  %v368_v11 = vmul.f32 %v2493_v44, %v336_v22 }
 0x1b5   :  { %v601_v51 = vpop.permute.xlu0 %600  ;;  %1144 = vrot.lane.b32.xlu1 %v2199_v45, %s1831_s14  ;;  %v464_v22 = vpop.permute.xlu1 %463  ;;  %v415_v4 = vmul.f32 %v2109_v0, %v367_v34  ;;  %v416_v1 = vmul.f32 %v2109_v0, %v368_v11 }
 0x1b6   :  { %v610_v5 = vsel %vm602_vm3, %v585_v43, %v601_v51  ;;  %v618_v57 = vsel %vm602_vm3, %v601_v51, %v585_v43  ;;  %999 = vrot.lane.b32.xlu0 %v2077_v55, %s1827_s13  ;;  %v292_v43 = vmul.f32 %v2032_v38, %v2250_v54  ;;  %v293_v51 = vmul.f32 %v2032_v38, %v2265_v29 }
 0x1b7   :  { %v473_v63 = vsel %vm465_vm2, %v448_v15, %v464_v22  ;;  %v481_v48 = vsel %vm465_vm2, %v464_v22, %v448_v15  ;;  %v641_v42 = vmul.f32 %v2524_v39, %v618_v57  ;;  %v642_v34 = vmul.f32 %v2527_v26, %v610_v5 }
 0x1b8   :  { %v504_v0 = vmul.f32 %v2512_v7, %v481_v48  ;;  %v505_v11 = vmul.f32 %v2515_v56, %v473_v63  ;;  %v335_v54 = vsel %vm328_vm1, %v2440_v13, %v323_v32  ;;  %v343_v38 = vsel %vm328_vm1, %v323_v32, %v2440_v13 }
 0x1b9   :  { %1267 = vrot.lane.b32.xlu1 %v2216_v37, %s1832_s15  ;;  %v431_v29 = vadd.f32 %v415_v4, %v292_v43  ;;  %v432_v15 = vadd.f32 %v416_v1, %v293_v51  ;;  %v689_v63 = vmul.f32 %v2209_v58, %v641_v42  ;;  %v690_v22 = vmul.f32 %v2209_v58, %v642_v34  ;;  %v2561_v45 = vpop.permute.xlu0 %872  ;;  %v1399_v4 = vld [vmem:[%s3710_s4 + $0x38] sm:$0xff] }
 0x1ba   :  { %v552_v57 = vmul.f32 %v2196_v41, %v504_v0  ;;  %v553_v5 = vmul.f32 %v2196_v41, %v505_v11  ;;  %1122 = vrot.lane.b32.xlu0 %v2091_v59, %s1831_s14  ;;  %v365_v32 = vmul.f32 %v2490_v6, %v343_v38  ;;  %v366_v13 = vmul.f32 %v2493_v44, %v335_v54  ;;  %v738_v11 = vpop.permute.xlu1 %737 }
 0x1bb   :  { %v472_v58 = vsel %vm465_vm2, %v2438_v49, %v2453_v60  ;;  %v480_v1 = vsel %vm465_vm2, %v2453_v60, %v2438_v49  ;;  %v758_v34 = vsub.s32 3, %v2465_v40  ;;  %v617_v0 = vsel %vm602_vm3, %v2459_v33, %v2447_v62 }
 0x1bc   :  { %v568_v48 = vadd.f32 %v552_v57, %v431_v29  ;;  %v569_v52 = vadd.f32 %v553_v5, %v432_v15  ;;  %v413_v43 = vmul.f32 %v2149_v16, %v365_v32  ;;  %v414_v51 = vmul.f32 %v2149_v16, %v366_v13 }
 0x1bd   :  { %1283 = vrot.lane.b32.xlu1 %v2231_v9, %s1832_s15  ;;  %v3933_v54 = vmov 8   ;;  %v290_v60 = vmul.f32 %v2063_v50, %v2216_v37  ;;  %v502_v16 = vmul.f32 %v2512_v7, %v480_v1  ;;  %v503_v49 = vmul.f32 %v2515_v56, %v472_v58  ;;  %v875_v29 = vpop.permute.xlu0 %874 }
 0x1be   :  { %1196 = vperm.xlu0 %1752, %v1956_v21   ;;  %v2569_v42 = vadd.f32 %v689_v63, %v568_v48  ;;  %v2571_v41 = vadd.f32 %v690_v22, %v569_v52  ;;  %v609_v52 = vsel %vm602_vm3, %v2447_v62, %v2459_v33  ;;  %v291_v38 = vmul.f32 %v2063_v50, %v2231_v9 }
 0x1bf   :  { %v429_v15 = vadd.f32 %v413_v43, %v290_v60  ;;  %v639_v33 = vmul.f32 %v2524_v39, %v617_v0  ;;  %v640_v62 = vmul.f32 %v2527_v26, %v609_v52  ;;  %v2606_v37 = vrot.slane %v2477_v36, %v758_v34 }
 0x1c0   :  { %v430_v57 = vadd.f32 %v414_v51, %v291_v38  ;;  %v550_v50 = vmul.f32 %v2153_v18, %v502_v16  ;;  %v747_v9 = vsel %vm739_vm4, %v2472_v2, %v738_v11  ;;  %v755_v63 = vsel %vm739_vm4, %v738_v11, %v2472_v2 }
 0x1c1   :  { %1437 = vperm.xlu1 %1748, %v1399_v4   ;;  %v2619_v22 = vrot.slane %v2482_v25, %v758_v34  ;;  %v746_v48 = vsel %vm739_vm4, %v2445_v46, %v2457_v31  ;;  %v895_v32 = vsub.s32 5, %v2465_v40  ;;  %v687_v2 = vmul.f32 %v2235_v20, %v639_v33  ;;  %v2632_v58 = vpop.permute.xlu0 %995 }
 0x1c2   :  { %1755 = vset.pattern.permute.xlu0 %v3933_v54  ;;  %v566_v13 = vadd.f32 %v550_v50, %v429_v15  ;;  %v778_v1 = vmul.f32 %v2606_v37, %v755_v63  ;;  %v884_v60 = vsel %vm876_vm5, %v2495_v3, %v875_v29  ;;  %v892_v16 = vsel %vm876_vm5, %v875_v29, %v2495_v3 }
 0x1c3   :  { %1353 = vperm.xlu0 %1755, %v1988_v28   ;;  %v551_v28 = vmul.f32 %v2153_v18, %v503_v49  ;;  %v754_v18 = vsel %vm739_vm4, %v2457_v31, %v2445_v46  ;;  %v779_v43 = vmul.f32 %v2619_v22, %v747_v9  ;;  %v777_v51 = vmul.f32 %v2619_v22, %v746_v48 }
 0x1c4   :  { %v776_v46 = vmul.f32 %v2606_v37, %v754_v18  ;;  %v703_v34 = vadd.f32 %v687_v2, %v566_v13  ;;  %v2644_v52 = vrot.slane %v2477_v36, %v895_v32  ;;  %v2647_v0 = vrot.slane %v2482_v25, %v895_v32 }
 0x1c5   :  { %848 = vrot.lane.b32.xlu1 %v2091_v59, %s1826_s0  ;;  %v567_v4 = vadd.f32 %v551_v28, %v430_v57  ;;  %v827_v54 = vmul.f32 %v2222_v61, %v779_v43  ;;  %v825_v15 = vmul.f32 %v2233_v14, %v777_v51  ;;  %v3936_v43 = vld [vmem:[#allocation33_spill] sm:$0xff] }
 0x1c6   :  { %v943_v5 = vpop.permute.xlu1 %942  ;;  %1749 = vset.pattern.permute.xlu1 %v3896_v19  ;;  %v824_v38 = vmul.f32 %v2233_v14, %v776_v46  ;;  %v915_v33 = vmul.f32 %v2644_v52, %v884_v60  ;;  %v916_v3 = vmul.f32 %v2647_v0, %v892_v16  ;;  %v1398_v51 = vld [vmem:[%s3710_s4 + $0x30] sm:$0xff] }
 0x1c7   :  { %1349 = vperm.xlu0 %1755, %v1918_v12   ;;  %v688_v12 = vmul.f32 %v2235_v20, %v640_v62  ;;  %v843_v50 = vadd.f32 %v827_v54, %v2571_v41 }
 0x1c8   :  { %v840_v28 = vadd.f32 %v824_v38, %v703_v34 }
 0x1c9   :  { %922 = vperm.xlu1 %1749, %v1956_v21   ;;  %v704_v20 = vadd.f32 %v688_v12, %v567_v4 }
 0x1cb   :  { %1345 = vperm.xlu0 %1755, %v1982_v27   ;;  %v2639_v31 = vpop.permute.xlu1 %797  ;;  %v826_v27 = vmul.f32 %v2222_v61, %v778_v1  ;;  %v841_v9 = vadd.f32 %v825_v15, %v704_v20 }
 0x1cd   :  { %1003 = vrot.lane.b32.xlu1 %v2135_v10, %s1827_s13  ;;  %v842_v62 = vadd.f32 %v826_v27, %v2569_v42 }
 0x1ce   :  { %v2651_v11 = vpop.permute.xlu0 %793  ;;  %1750 = vset.pattern.permute.xlu1 %v3930_v53 }
 0x1cf   :  { %1341 = vperm.xlu0 %1755, %v1902_v8   ;;  %v857_v49 = vpop.permute.xlu1 %856 }
 0x1d0   :  { %v883_v61 = vsel %vm876_vm5, %v857_v49, %v2561_v45  ;;  %v891_v57 = vsel %vm876_vm5, %v2561_v45, %v857_v49 }
 0x1d1   :  { %v913_v29 = vmul.f32 %v2644_v52, %v883_v61  ;;  %v914_v8 = vmul.f32 %v2647_v0, %v891_v57  ;;  %1126 = vrot.lane.b32.xlu1 %v2151_v17, %s1831_s14 }
 0x1d3   :  { %v947_v14 = vpop.permute.xlu0 %946  ;;  %v961_v63 = vmul.f32 %v943_v5, %v913_v29  ;;  %v962_v45 = vmul.f32 %v943_v5, %v914_v8  ;;  %1337 = vperm.xlu0 %1755, %v1965_v23   ;;  %v2680_v32 = vpop.permute.xlu1 %938  ;;  %v1032_v5 = vsub.s32 6, %v2465_v40  ;;  %v3940_v29 = vld [vmem:[#allocation8_spill] sm:$0xff] }
 0x1d4   :  { %v963_v48 = vmul.f32 %v947_v14, %v915_v33  ;;  %v964_v18 = vmul.f32 %v947_v14, %v916_v3  ;;  %3934 = vst [vmem:[#allocation89_spill] sm:$0xff] %v2680_v32  ;;  %v3937_v33 = vld [vmem:[#allocation13_spill] sm:$0xff]  ;;  %v3981_v32 = vld [vmem:[#allocation83_spill] sm:$0xff] }
 0x1d5   :  { %1142 = vrot.lane.b32.xlu1 %v2167_v24, %s1831_s14  ;;  %v977_v2 = vadd.f32 %v961_v63, %v840_v28  ;;  %v978_v12 = vadd.f32 %v962_v45, %v841_v9  ;;  %v2706_v34 = vrot.slane %v2477_v36, %v1032_v5  ;;  %v2709_v20 = vrot.slane %v2482_v25, %v1032_v5  ;;  %v3941_v45 = vld [vmem:[#allocation20_spill] sm:$0xff] }
 0x1d6   :  { %v979_v13 = vadd.f32 %v963_v48, %v842_v62  ;;  %v980_v4 = vadd.f32 %v964_v18, %v843_v50 }
 0x1d7   :  { %v2684_v42 = vpop.permute.xlu0 %934  ;;  %997 = vrot.lane.b32.xlu0 %v2051_v47, %s1827_s13  ;;  %v1012_v41 = vpop.permute.xlu1 %1011  ;;  %v3965_v47 = vld [vmem:[#allocation65_spill] sm:$0xff] }
 0x1d8   :  { %v1021_v27 = vsel %vm1013_vm6, %v2632_v58, %v1012_v41  ;;  %v1029_v54 = vsel %vm1013_vm6, %v1012_v41, %v2632_v58  ;;  %v3943_v41 = vld [vmem:[#allocation22_spill] sm:$0xff] }
 0x1d9   :  { %1265 = vrot.lane.b32.xlu1 %v2182_v30, %s1832_s15  ;;  %v1052_v16 = vmul.f32 %v2706_v34, %v1021_v27  ;;  %v1053_v49 = vmul.f32 %v2709_v20, %v1029_v54 }
 0x1db   :  { %v2690_v23 = vpop.permute.xlu0 %852  ;;  %1136 = vrot.lane.b32.xlu0 %v2077_v55, %s1831_s14  ;;  %v2695_v1 = vpop.permute.xlu1 %1220  ;;  %v3963_v55 = vld [vmem:[#allocation72_spill] sm:$0xff] }
 0x1dc   :  { %3935 = vst [vmem:[#allocation90_spill] sm:$0xff] %v2695_v1  ;;  %v3967_v1 = vld [vmem:[#allocation66_spill] sm:$0xff] }
 0x1dd   :  { %1281 = vrot.lane.b32.xlu1 %v3936_v43, %s1832_s15 }
 0x1df   :  { %v2700_v46 = vpop.permute.xlu0 %930  ;;  %1259 = vrot.lane.b32.xlu0 %v2091_v59, %s1832_s15  ;;  %v2719_v60 = vpop.permute.xlu1 %854 }
 0x1e1   :  { %1432 = vperm.xlu1 %1750, %v1398_v51  }
 0x1e3   :  { %1333 = vperm.xlu0 %1755, %v1956_v21   ;;  %v2724_v38 = vpop.permute.xlu1 %870  ;;  %v2738_v21 = vld [vmem:[%s3709_s3] sm:$0xff] }
 0x1e4   :  { %v1084_v15 = vpop.permute.xlu0 %1083 }
 0x1e5   :  { %v1100_v61 = vmul.f32 %v1084_v15, %v1052_v16  ;;  %v1101_v57 = vmul.f32 %v1084_v15, %v1053_v49  ;;  %846 = vrot.lane.b32.xlu1 %v3937_v33, %s1826_s0  ;;  %v1393_v16 = vld [vmem:[%s3710_s4 + $0x8] sm:$0xff] }
 0x1e6   :  { %1751 = vset.pattern.permute.xlu1 %v3896_v19 }
 0x1e7   :  { %v2728_v58 = vadd.f32 %v1100_v61, %v979_v13  ;;  %v2730_v3 = vadd.f32 %v1101_v57, %v980_v4  ;;  %1118 = vrot.lane.b32.xlu0 %v3940_v29, %s1831_s14  ;;  %v994_v8 = vpop.permute.xlu1 %993  ;;  %v1397_v61 = vld [vmem:[%s3710_s4 + $0x28] sm:$0xff] }
 0x1e8   :  { %v1080_v14 = vpop.permute.xlu0 %1079 }
 0x1e9   :  { %3938 = vst [vmem:[#allocation33_spill] sm:$0xff] %v2728_v58  ;;  %3939 = vst [vmem:[#allocation13_spill] sm:$0xff] %v2730_v3  ;;  %918 = vperm.xlu1 %1751, %v2738_v21   ;;  %v3962_v58 = vld [vmem:[#allocation76_spill] sm:$0xff] }
 0x1eb   :  { %1257 = vrot.lane.b32.xlu0 %v3937_v33, %s1832_s15  ;;  %v1010_v62 = vpop.permute.xlu1 %1009 }
 0x1ec   :  { %v1076_v50 = vpop.permute.xlu0 %1075  ;;  %v1020_v19 = vsel %vm1013_vm6, %v994_v8, %v1010_v62  ;;  %v1028_v28 = vsel %vm1013_vm6, %v1010_v62, %v994_v8 }
 0x1ed   :  { %v1050_v9 = vmul.f32 %v2706_v34, %v1020_v19  ;;  %v1051_v63 = vmul.f32 %v2709_v20, %v1028_v28  ;;  %1001 = vrot.lane.b32.xlu1 %v3941_v45, %s1827_s13 }
 0x1ee   :  { %1753 = vset.pattern.permute.xlu1 %v3930_v53 }
 0x1ef   :  { %v1098_v48 = vmul.f32 %v1080_v14, %v1050_v9  ;;  %v1099_v18 = vmul.f32 %v1080_v14, %v1051_v63  ;;  %1329 = vperm.xlu0 %1755, %v2738_v21   ;;  %v2753_v13 = vpop.permute.xlu1 %1132 }
 0x1f0   :  { %3942 = vst [vmem:[#allocation8_spill] sm:$0xff] %v2753_v13  ;;  %v2755_v4 = vpop.permute.xlu0 %1071 }
 0x1f1   :  { %1124 = vrot.lane.b32.xlu1 %v3943_v41, %s1831_s14  ;;  %v2759_v5 = vadd.f32 %v1098_v48, %v977_v2  ;;  %v2761_v51 = vadd.f32 %v1099_v18, %v978_v12 }
 0x1f3   :  { %1255 = vrot.lane.b32.xlu0 %v3940_v29, %s1832_s15  ;;  %v2765_v27 = vpop.permute.xlu1 %1148 }
 0x1f4   :  { %3944 = vst [vmem:[#allocation22_spill] sm:$0xff] %v2765_v27  ;;  %v2767_v54 = vpop.permute.xlu0 %866  ;;  %1759 = vset.pattern.permute.xlu0 %v3930_v53 }
 0x1f5   :  { %1140 = vrot.lane.b32.xlu1 %v2135_v10, %s1831_s14 }
 0x1f7   :  { %v2775_v2 = vpop.permute.xlu1 %1357  ;;  %1407 = vperm.xlu0 %1759, %v1393_v16   ;;  %v3950_v16 = vmov 6  }
 0x1f8   :  { %3945 = vst [vmem:[#allocation91_spill] sm:$0xff] %v2775_v2  ;;  %v2777_v12 = vpop.permute.xlu0 %989 }
 0x1f9   :  { %1263 = vrot.lane.b32.xlu1 %v2151_v17, %s1832_s15 }
 0x1fc   :  { %v2781_v49 = vpop.permute.xlu0 %1067  ;;  %v2783_v15 = vpop.permute.xlu1 %789 }
 0x1fd   :  { %3946 = vst [vmem:[#allocation92_spill] sm:$0xff] %v2781_v49  ;;  %3947 = vst [vmem:[#allocation93_spill] sm:$0xff] %v2783_v15  ;;  %1279 = vrot.lane.b32.xlu1 %v2167_v24, %s1832_s15 }
 0x200   :  { %v2790_v57 = vpop.permute.xlu0 %864  ;;  %v869_v8 = vpop.permute.xlu1 %868 }
 0x201   :  { %3948 = vst [vmem:[#allocation94_spill] sm:$0xff] %v2790_v57  ;;  %v881_v14 = vsel %vm876_vm5, %v2690_v23, %v869_v8  ;;  %v889_v62 = vsel %vm876_vm5, %v869_v8, %v2690_v23  ;;  %1427 = vperm.xlu1 %1753, %v1397_v61   ;;  %v3951_v23 = vld [vmem:[#allocation63_spill] sm:$0xff] }
 0x202   :  { %v909_v19 = vmul.f32 %v2644_v52, %v881_v14  ;;  %v910_v28 = vmul.f32 %v2647_v0, %v889_v62  ;;  %v3952_v61 = vld [vmem:[#allocation67_spill] sm:$0xff] }
 0x203   :  { %v340_v8 = vsel %vm328_vm1, %v3952_v61, %v3951_v23  ;;  %v332_v14 = vsel %vm328_vm1, %v3951_v23, %v3952_v61  ;;  %v3954_v61 = vld [vmem:[#allocation64_spill] sm:$0xff] }
 0x204   :  { %v2801_v9 = vmul.f32 %v2684_v42, %v909_v19  ;;  %v2804_v63 = vmul.f32 %v2684_v42, %v910_v28  ;;  %v2806_v48 = vpop.permute.xlu0 %987  ;;  %v992_v18 = vpop.permute.xlu1 %991  ;;  %v360_v23 = vmul.f32 %v2493_v44, %v332_v14 }
 0x205   :  { %3949 = vst [vmem:[#allocation95_spill] sm:$0xff] %v2806_v48  ;;  %844 = vrot.lane.b32.xlu1 %v3940_v29, %s1826_s0 }
 0x206   :  { %1754 = vset.pattern.permute.xlu1 %v3950_v16  ;;  %v359_v16 = vmul.f32 %v2490_v6, %v340_v8  ;;  %v3959_v8 = vld [vmem:[#allocation6_spill] sm:$0xff] }
 0x207   :  { %v284_v3 = vmul.f32 %v3959_v8, %v3943_v41 }
 0x208   :  { %v2819_v42 = vpop.permute.xlu0 %1063  ;;  %v1008_v62 = vpop.permute.xlu1 %1007 }
 0x209   :  { %3953 = vst [vmem:[#allocation63_spill] sm:$0xff] %v2819_v42  ;;  %v1019_v19 = vsel %vm1013_vm6, %v992_v18, %v1008_v62  ;;  %v1027_v28 = vsel %vm1013_vm6, %v1008_v62, %v992_v18  ;;  %983 = vrot.lane.b32.xlu1 %v3937_v33, %s1827_s13  ;;  %v3955_v42 = vld [vmem:[#allocation68_spill] sm:$0xff] }
 0x20a   :  { %v1048_v15 = vmul.f32 %v2706_v34, %v1019_v19  ;;  %v1049_v59 = vmul.f32 %v2709_v20, %v1027_v28  ;;  %v477_v49 = vsel %vm465_vm2, %v3955_v42, %v3954_v61  ;;  %v285_v19 = vmul.f32 %v3959_v8, %v2135_v10 }
 0x20b   :  { %v469_v14 = vsel %vm465_vm2, %v3954_v61, %v3955_v42  ;;  %v333_v8 = vsel %vm328_vm1, %v3963_v55, %v3962_v58  ;;  %v496_v42 = vmul.f32 %v2512_v7, %v477_v49  ;;  %v3964_v61 = vld [vmem:[#allocation69_spill] sm:$0xff]  ;;  %v1169_v49 = vsub.s32 7, %v2465_v40 }
 0x20c   :  { %v2835_v48 = vmul.f32 %v1076_v50, %v1048_v15  ;;  %v2837_v57 = vmul.f32 %v1076_v50, %v1049_v59  ;;  %v2839_v18 = vpop.permute.xlu0 %862  ;;  %v1131_v62 = vpop.permute.xlu1 %1130  ;;  %v3960_v15 = vld [vmem:[#allocation12_spill] sm:$0xff]  ;;  %v3961_v50 = vld [vmem:[#allocation17_spill] sm:$0xff] }
 0x20d   :  { %3958 = vst [vmem:[#allocation68_spill] sm:$0xff] %v2839_v18  ;;  %1055 = vperm.xlu1 %1754, %v2738_v21   ;;  %v2852_v59 = vmul.f32 %v3960_v15, %v2151_v17  ;;  %v407_v28 = vmul.f32 %v3961_v50, %v359_v16  ;;  %v287_v18 = vmul.f32 %v3960_v15, %v2167_v24  ;;  %v3966_v15 = vld [vmem:[#allocation70_spill] sm:$0xff] }
 0x20e   :  { %3956 = vst [vmem:[#allocation67_spill] sm:$0xff] %v2835_v48  ;;  %3957 = vst [vmem:[#allocation64_spill] sm:$0xff] %v2837_v57  ;;  %v408_v2 = vmul.f32 %v3961_v50, %v360_v23  ;;  %v606_v17 = vsel %vm602_vm3, %v3965_v47, %v3964_v61  ;;  %v614_v16 = vsel %vm602_vm3, %v3964_v61, %v3965_v47 }
 0x20f   :  { %v497_v24 = vmul.f32 %v2515_v56, %v469_v14  ;;  %v743_v57 = vsel %vm739_vm4, %v3967_v1, %v3966_v15  ;;  %v751_v48 = vsel %vm739_vm4, %v3966_v15, %v3967_v1  ;;  %v362_v47 = vmul.f32 %v2493_v44, %v333_v8  ;;  %v3969_v15 = vld [vmem:[#allocation29_spill] sm:$0xff] }
 0x210   :  { %v2878_v23 = vpop.permute.xlu0 %985  ;;  %v1147_v50 = vpop.permute.xlu1 %1146  ;;  %v423_v40 = vadd.f32 %v407_v28, %v284_v3  ;;  %v634_v13 = vmul.f32 %v2527_v26, %v606_v17  ;;  %v341_v1 = vsel %vm328_vm1, %v3962_v58, %v3963_v55  ;;  %v424_v8 = vadd.f32 %v408_v2, %v285_v19  ;;  %v3971_v17 = vld [vmem:[#allocation75_spill] sm:$0xff] }
 0x211   :  { %3968 = vst [vmem:[#allocation6_spill] sm:$0xff] %v2878_v23  ;;  %v1157_v14 = vsel %vm1150_vm7, %v1131_v62, %v1147_v50  ;;  %v1165_v61 = vsel %vm1150_vm7, %v1147_v50, %v1131_v62  ;;  %1138 = vrot.lane.b32.xlu1 %v3941_v45, %s1831_s14  ;;  %v633_v23 = vmul.f32 %v2524_v39, %v614_v16  ;;  %v3970_v62 = vld [vmem:[#allocation7_spill] sm:$0xff] }
 0x212   :  { %1756 = vset.pattern.permute.xlu1 %v3930_v53  ;;  %v544_v27 = vmul.f32 %v3969_v15, %v496_v42  ;;  %v2901_v50 = vmul.f32 %v3970_v62, %v2182_v30  ;;  %v2905_v3 = vmul.f32 %v3970_v62, %v3936_v43  ;;  %v545_v28 = vmul.f32 %v3969_v15, %v497_v24  ;;  %v3972_v16 = vld [vmem:[#allocation71_spill] sm:$0xff]  ;;  %v3975_v42 = vld [vmem:[#allocation25_spill] sm:$0xff]  ;;  %v3977_v53 = vld [vmem:[#allocation32_spill] sm:$0xff] }
 0x213   :  { %v470_v55 = vsel %vm465_vm2, %v3972_v16, %v3971_v17  ;;  %v478_v58 = vsel %vm465_vm2, %v3971_v17, %v3972_v16  ;;  %v770_v2 = vmul.f32 %v2606_v37, %v751_v48  ;;  %v361_v43 = vmul.f32 %v2490_v6, %v341_v1 }
 0x214   :  { %v2917_v30 = vpop.permute.xlu1 %1269  ;;  %v2919_v19 = vpop.permute.xlu0 %1059  ;;  %v410_v24 = vmul.f32 %v3975_v42, %v362_v47  ;;  %v771_v15 = vmul.f32 %v2619_v22, %v743_v57  ;;  %v2925_v62 = vrot.slane %v2477_v36, %v1169_v49  ;;  %v681_v17 = vmul.f32 %v3977_v53, %v633_v23  ;;  %v3980_v57 = vld [vmem:[#allocation74_spill] sm:$0xff] }
 0x215   :  { %3973 = vst [vmem:[#allocation12_spill] sm:$0xff] %v2917_v30  ;;  %3974 = vst [vmem:[#allocation17_spill] sm:$0xff] %v2919_v19  ;;  %1261 = vrot.lane.b32.xlu1 %v3943_v41, %s1832_s15  ;;  %v682_v48 = vmul.f32 %v3977_v53, %v634_v13  ;;  %v560_v16 = vadd.f32 %v544_v27, %v423_v40  ;;  %v2932_v30 = vrot.slane %v2482_v25, %v1169_v49  ;;  %v3979_v19 = vld [vmem:[#allocation78_spill] sm:$0xff]  ;;  %v3982_v41 = vld [vmem:[#allocation79_spill] sm:$0xff] }
 0x216   :  { %3976 = vst [vmem:[#allocation76_spill] sm:$0xff] %v2925_v62  ;;  %v498_v1 = vmul.f32 %v2512_v7, %v478_v58  ;;  %v499_v47 = vmul.f32 %v2515_v56, %v470_v55  ;;  %v607_v36 = vsel %vm602_vm3, %v3980_v57, %v3979_v19  ;;  %v561_v45 = vadd.f32 %v545_v28, %v424_v8  ;;  %v3983_v8 = vld [vmem:[#allocation77_spill] sm:$0xff] }
 0x217   :  { %3978 = vst [vmem:[#allocation72_spill] sm:$0xff] %v2932_v30  ;;  %v334_v23 = vsel %vm328_vm1, %v3982_v41, %v3981_v32  ;;  %v342_v25 = vsel %vm328_vm1, %v3981_v32, %v3982_v41  ;;  %v1187_v53 = vmul.f32 %v2925_v62, %v1157_v14  ;;  %v1188_v13 = vmul.f32 %v2932_v30, %v1165_v61  ;;  %v3984_v28 = vld [vmem:[#allocation73_spill] sm:$0xff] }
 0x218   :  { %v2950_v27 = vpop.permute.xlu1 %1285  ;;  %v409_v49 = vmul.f32 %v3975_v42, %v361_v43  ;;  %v426_v40 = vadd.f32 %v410_v24, %v287_v18  ;;  %v744_v55 = vsel %vm739_vm4, %v3984_v28, %v3983_v8  ;;  %v752_v58 = vsel %vm739_vm4, %v3983_v8, %v3984_v28  ;;  %v1396_v42 = vld [vmem:[%s3710_s4 + $0x20] sm:$0xff]  ;;  %v3985_v8 = vld [vmem:[#allocation84_spill] sm:$0xff] }
 0x219   :  { %v1217_v32 = vpop.permute.xlu0 %1216  ;;  %1277 = vrot.lane.b32.xlu1 %v2135_v10, %s1832_s15  ;;  %v615_v14 = vsel %vm602_vm3, %v3979_v19, %v3980_v57  ;;  %v636_v18 = vmul.f32 %v2527_v26, %v607_v36  ;;  %v363_v24 = vmul.f32 %v2490_v6, %v342_v25  ;;  %v364_v41 = vmul.f32 %v2493_v44, %v334_v23  ;;  %v3986_v28 = vld [vmem:[#allocation80_spill] sm:$0xff]  ;;  %v3987_v23 = vld [vmem:[#allocation26_spill] sm:$0xff] }
 0x21a   :  { %v1235_v61 = vmul.f32 %v1217_v32, %v1187_v53  ;;  %v1236_v43 = vmul.f32 %v1217_v32, %v1188_v13  ;;  %v471_v10 = vsel %vm465_vm2, %v3986_v28, %v3985_v8  ;;  %v479_v19 = vsel %vm465_vm2, %v3985_v8, %v3986_v28  ;;  %v3990_v8 = vld [vmem:[#allocation85_spill] sm:$0xff] }
 0x21b   :  { %v697_v57 = vadd.f32 %v681_v17, %v560_v16  ;;  %v698_v36 = vadd.f32 %v682_v48, %v561_v45  ;;  %v546_v32 = vmul.f32 %v3987_v23, %v498_v1  ;;  %v547_v44 = vmul.f32 %v3987_v23, %v499_v47  ;;  %v3988_v48 = vld [vmem:[#allocation36_spill] sm:$0xff] }
 0x21c   :  { %v2982_v53 = vadd.f32 %v1235_v61, %v2759_v5  ;;  %v2985_v13 = vadd.f32 %v1236_v43, %v2761_v51  ;;  %v2987_v25 = vpop.permute.xlu1 %785  ;;  %v425_v6 = vadd.f32 %v409_v49, %v2852_v59  ;;  %v635_v30 = vmul.f32 %v2524_v39, %v615_v14  ;;  %v3989_v61 = vld [vmem:[#allocation19_spill] sm:$0xff]  ;;  %v3991_v59 = vld [vmem:[#allocation81_spill] sm:$0xff] }
 0x21d   :  { %1422 = vperm.xlu1 %1756, %v1396_v42   ;;  %v772_v17 = vmul.f32 %v2606_v37, %v752_v58  ;;  %v773_v45 = vmul.f32 %v2619_v22, %v744_v55  ;;  %v500_v5 = vmul.f32 %v2512_v7, %v479_v19  ;;  %v501_v51 = vmul.f32 %v2515_v56, %v471_v10 }
 0x21e   :  { %v684_v16 = vmul.f32 %v3988_v48, %v636_v18  ;;  %v411_v43 = vmul.f32 %v3989_v61, %v363_v24  ;;  %v412_v1 = vmul.f32 %v3989_v61, %v364_v41  ;;  %v563_v47 = vadd.f32 %v547_v44, %v426_v40  ;;  %v3992_v41 = vld [vmem:[#allocation31_spill] sm:$0xff] }
 0x21f   :  { %v608_v49 = vsel %vm602_vm3, %v3991_v59, %v3990_v8  ;;  %v616_v55 = vsel %vm602_vm3, %v3990_v8, %v3991_v59  ;;  %v818_v58 = vmul.f32 %v2651_v11, %v770_v2  ;;  %v819_v14 = vmul.f32 %v2651_v11, %v771_v15  ;;  %v3994_v8 = vld [vmem:[#allocation86_spill] sm:$0xff] }
 0x220   :  { %v851_v18 = vpop.permute.xlu1 %850  ;;  %v683_v42 = vmul.f32 %v3988_v48, %v635_v30  ;;  %v562_v24 = vadd.f32 %v546_v32, %v425_v6  ;;  %v548_v28 = vmul.f32 %v3992_v41, %v500_v5  ;;  %v549_v2 = vmul.f32 %v3992_v41, %v501_v51  ;;  %v3028_v48 = vpop.permute.xlu0 %1212  ;;  %v3995_v59 = vld [vmem:[#allocation82_spill] sm:$0xff] }
 0x221   :  { %v880_v44 = vsel %vm876_vm5, %v851_v18, %v2767_v54  ;;  %v888_v40 = vsel %vm876_vm5, %v2767_v54, %v851_v18  ;;  %981 = vrot.lane.b32.xlu1 %v3940_v29, %s1827_s13  ;;  %v3993_v6 = vmov 7   ;;  %v427_v15 = vadd.f32 %v411_v43, %v2901_v50 }
 0x222   :  { %v907_v11 = vmul.f32 %v2644_v52, %v880_v44  ;;  %v908_v30 = vmul.f32 %v2647_v0, %v888_v40  ;;  %1757 = vset.pattern.permute.xlu1 %v3993_v6  ;;  %v428_v10 = vadd.f32 %v412_v1, %v2905_v3  ;;  %v637_v19 = vmul.f32 %v2524_v39, %v616_v55 }
 0x223   :  { %v638_v54 = vmul.f32 %v2527_v26, %v608_v49  ;;  %v834_v23 = vadd.f32 %v818_v58, %v697_v57  ;;  %v835_v32 = vadd.f32 %v819_v14, %v698_v36  ;;  %v745_v50 = vsel %vm739_vm4, %v3995_v59, %v3994_v8 }
 0x224   :  { %v955_v5 = vmul.f32 %v2700_v46, %v907_v11  ;;  %v956_v51 = vmul.f32 %v2700_v46, %v908_v30  ;;  %v3032_v61 = vpop.permute.xlu1 %926  ;;  %v753_v3 = vsel %vm739_vm4, %v3994_v8, %v3995_v59  ;;  %v820_v57 = vmul.f32 %v2639_v31, %v772_v17  ;;  %v3071_v6 = vpop.permute.xlu0 %1208  ;;  %v3999_v59 = vld [vmem:[#allocation20_spill] sm:$0xff] }
 0x225   :  { %v821_v36 = vmul.f32 %v2639_v31, %v773_v45  ;;  %1120 = vrot.lane.b32.xlu1 %v3937_v33, %s1831_s14  ;;  %v882_v46 = vsel %vm876_vm5, %v2719_v60, %v2724_v38  ;;  %v890_v43 = vsel %vm876_vm5, %v2724_v38, %v2719_v60  ;;  %v564_v17 = vadd.f32 %v548_v28, %v427_v15  ;;  %v3996_v31 = vld [vmem:[#allocation34_spill] sm:$0xff] }
 0x226   :  { %v3054_v1 = vadd.f32 %v955_v5, %v834_v23  ;;  %v3056_v49 = vadd.f32 %v956_v51, %v835_v32  ;;  %v565_v55 = vadd.f32 %v549_v2, %v428_v10  ;;  %v685_v45 = vmul.f32 %v3996_v31, %v637_v19  ;;  %v3998_v5 = vld [vmem:[#allocation89_spill] sm:$0xff] }
 0x227   :  { %v686_v58 = vmul.f32 %v3996_v31, %v638_v54  ;;  %v774_v14 = vmul.f32 %v2606_v37, %v753_v3  ;;  %v775_v18 = vmul.f32 %v2619_v22, %v745_v50  ;;  %v699_v44 = vadd.f32 %v683_v42, %v562_v24  ;;  %v3997_v54 = vld [vmem:[#allocation37_spill] sm:$0xff]  ;;  %v4000_v50 = vld [vmem:[#allocation22_spill] sm:$0xff] }
 0x228   :  { %v700_v40 = vadd.f32 %v684_v16, %v563_v47  ;;  %v1006_v41 = vpop.permute.xlu1 %1005  ;;  %v911_v11 = vmul.f32 %v2644_v52, %v882_v46  ;;  %v912_v60 = vmul.f32 %v2647_v0, %v890_v43  ;;  %v701_v42 = vadd.f32 %v685_v45, %v564_v17  ;;  %v1395_v46 = vld [vmem:[%s3710_s4 + $0x18] sm:$0xff]  ;;  %v4003_v45 = vld [vmem:[#allocation12_spill] sm:$0xff] }
 0x229   :  { %v1018_v38 = vsel %vm1013_vm6, %v2777_v12, %v1006_v41  ;;  %v1026_v28 = vsel %vm1013_vm6, %v1006_v41, %v2777_v12  ;;  %1192 = vperm.xlu1 %1757, %v2738_v21   ;;  %v836_v2 = vadd.f32 %v820_v57, %v699_v44  ;;  %v702_v24 = vadd.f32 %v686_v58, %v565_v55  ;;  %v3105_v55 = vld [vmem:[%s3713_s7 + $0x10] ss:$0 sm:$0xff]  ;;  %v3110_v31 = vld [vmem:[%s3713_s7 + $0x18] ss:$0 sm:$0xff]  ;;  %v4005_v41 = vld [vmem:[#allocation72_spill] sm:$0xff] }
 0x22a   :  { %v837_v30 = vadd.f32 %v821_v36, %v700_v40  ;;  %v1046_v16 = vmul.f32 %v2706_v34, %v1018_v38  ;;  %v1047_v47 = vmul.f32 %v2709_v20, %v1026_v28  ;;  %v822_v23 = vmul.f32 %v3997_v54, %v774_v14 }
 0x22b   :  { %v973_v15 = vadd.f32 %v2801_v9, %v836_v2  ;;  %v823_v32 = vmul.f32 %v3997_v54, %v775_v18  ;;  %v959_v51 = vmul.f32 %v3998_v5, %v911_v11  ;;  %v960_v8 = vmul.f32 %v3998_v5, %v912_v60  ;;  %v4001_v9 = vld [vmem:[#allocation8_spill] sm:$0xff]  ;;  %v3120_v18 = vpop.permute.xlu0 %1204  ;;  %v4008_v54 = vld [vmem:[#allocation90_spill] sm:$0xff]  ;;  %v4009_v5 = vld [vmem:[#allocation11_spill] sm:$0xff] }
 0x22c   :  { %v974_v10 = vadd.f32 %v2804_v63, %v837_v30  ;;  %v1094_v12 = vmul.f32 %v2755_v4, %v1046_v16  ;;  %v1095_v21 = vmul.f32 %v2755_v4, %v1047_v47  ;;  %v1129_v19 = vpop.permute.xlu1 %1128  ;;  %v1158_v63 = vsel %vm1150_vm7, %v4001_v9, %v4000_v50  ;;  %4004 = vst [vmem:[#allocation69_spill] sm:$0xff] %v3120_v18 }
 0x22d   :  { %1275 = vrot.lane.b32.xlu1 %v3999_v59, %s1832_s15  ;;  %v1166_v4 = vsel %vm1150_vm7, %v4000_v50, %v4001_v9  ;;  %v4002_v36 = vmov 0   ;;  %v838_v43 = vadd.f32 %v822_v23, %v701_v42  ;;  %v839_v17 = vadd.f32 %v823_v32, %v702_v24  ;;  %v4006_v42 = vld [vmem:[#allocation67_spill] sm:$0xff] }
 0x22e   :  { %v3094_v3 = vadd.f32 %v1094_v12, %v973_v15  ;;  %v3096_v57 = vadd.f32 %v1095_v21, %v974_v10  ;;  %1758 = vset.pattern.permute.xlu1 %v4002_v36  ;;  %v1295_v58 = vsel %vm1287_vm8, %v4003_v45, %v2950_v27  ;;  %v1303_v14 = vsel %vm1287_vm8, %v2950_v27, %v4003_v45  ;;  %v4007_v15 = vld [vmem:[#allocation64_spill] sm:$0xff]  ;;  %v4011_v9 = vld [vmem:[#allocation91_spill] sm:$0xff] }
 0x22f   :  { %v1189_v40 = vmul.f32 %v2925_v62, %v1158_v63  ;;  %v1190_v11 = vmul.f32 %v4005_v41, %v1166_v4  ;;  %v975_v28 = vadd.f32 %v959_v51, %v838_v43  ;;  %v976_v2 = vadd.f32 %v960_v8, %v839_v17  ;;  %v3142_v51 = vpop.permute.xlu0 %1200  ;;  %v4012_v36 = vld [vmem:[#allocation15_spill] sm:$0xff]  ;;  %v4014_v17 = vld [vmem:[#allocation13_spill] sm:$0xff] }
 0x230   :  { %v1145_v44 = vpop.permute.xlu1 %1144  ;;  %v1326_v16 = vmul.f32 %v3105_v55, %v1295_v58  ;;  %v1327_v47 = vmul.f32 %v3110_v31, %v1303_v14  ;;  %4010 = vst [vmem:[#allocation65_spill] sm:$0xff] %v3142_v51  ;;  %v1394_v58 = vld [vmem:[%s3710_s4 + $0x10] sm:$0xff]  ;;  %v4027_v51 = vld [vmem:[#allocation23_spill] sm:$0xff] }
 0x231   :  { %v1156_v60 = vsel %vm1150_vm7, %v1129_v19, %v1145_v44  ;;  %v1164_v38 = vsel %vm1150_vm7, %v1145_v44, %v1129_v19  ;;  %1417 = vperm.xlu1 %1758, %v1395_v46   ;;  %v1112_v24 = vadd.f32 %v4006_v42, %v975_v28  ;;  %v1113_v10 = vadd.f32 %v4007_v15, %v976_v2  ;;  %v4013_v46 = vld [vmem:[#allocation33_spill] sm:$0xff] }
 0x232   :  { %v1185_v30 = vmul.f32 %v2925_v62, %v1156_v60  ;;  %v1186_v27 = vmul.f32 %v4005_v41, %v1164_v38  ;;  %v1237_v23 = vmul.f32 %v4008_v54, %v1189_v40  ;;  %v1238_v32 = vmul.f32 %v4008_v54, %v1190_v11 }
 0x233   :  { %v1374_v63 = vmul.f32 %v4011_v9, %v1326_v16  ;;  %v1375_v4 = vmul.f32 %v4011_v9, %v1327_v47  ;;  %v3159_v40 = vpop.permute.xlu0 %860  ;;  %v4016_v16 = vld [vmem:[#allocation94_spill] sm:$0xff] }
 0x234   :  { %v1233_v12 = vmul.f32 %v3028_v48, %v1185_v30  ;;  %v1234_v21 = vmul.f32 %v3028_v48, %v1186_v27  ;;  %v3136_v19 = vpop.permute.xlu1 %1267  ;;  %v1253_v43 = vadd.f32 %v1237_v23, %v4013_v46  ;;  %v1254_v45 = vadd.f32 %v1238_v32, %v4014_v17  ;;  %4015 = vst [vmem:[#allocation70_spill] sm:$0xff] %v3159_v40  ;;  %v4018_v46 = vld [vmem:[#allocation47_spill] sm:$0xff]  ;;  %v4036_v40 = vld [vmem:[#allocation21_spill] sm:$0xff] }
 0x235   :  { %1134 = vrot.lane.b32.xlu1 %v4009_v5, %s1831_s14 }
 0x236   :  { %v3144_v8 = vadd.f32 %v1233_v12, %v1112_v24  ;;  %v3146_v50 = vadd.f32 %v1234_v21, %v1113_v10  ;;  %v1390_v14 = vadd.f32 %v1374_v63, %v1253_v43  ;;  %v1391_v44 = vadd.f32 %v1375_v4, %v1254_v45  ;;  %v1392_v12 = vld [vmem:[%s3710_s4] sm:$0xff] }
 0x237   :  { %v3178_v24 = vpop.permute.xlu0 %999  ;;  %v4019_v43 = vld [vmem:[#allocation51_spill] sm:$0xff] }
 0x238   :  { %v3150_v48 = vpop.permute.xlu1 %1283  ;;  %4017 = vst [vmem:[#allocation66_spill] sm:$0xff] %v3178_v24  ;;  %v338_v17 = vsel %vm328_vm1, %v4019_v43, %v4018_v46  ;;  %v1601_v45 = vld [vmem:[%s3712_s6] sm:$0xff] }
 0x239   :  { %1273 = vrot.lane.b32.xlu1 %v4012_v36, %s1832_s15 }
 0x23c   :  { %v1438_v11 = vpop.permute.xlu1 %1437 }
 0x23d   :  { %v3161_v60 = vadd.f32 %v1438_v11, %v1390_v14  ;;  %v3163_v38 = vadd.f32 %v1438_v11, %v1391_v44  ;;  %1412 = vperm.xlu1 %1758, %v1394_v58   ;;  %v4020_v44 = vld [vmem:[#allocation52_spill] sm:$0xff] }
 0x23e   :  { %v4021_v11 = vld [vmem:[#allocation48_spill] sm:$0xff] }
 0x23f   :  { %v1470_v28 = vmul.f32 %v3161_v60, %v3161_v60  ;;  %v1471_v2 = vmul.f32 %v3163_v38, %v3163_v38 }
 0x240   :  { %v849_v30 = vpop.permute.xlu1 %848 }
 0x241   :  { %v1486_v27 = vmul.f32 %v1470_v28, %v3161_v60  ;;  %v879_v47 = vsel %vm876_vm5, %v849_v30, %v4016_v16  ;;  %v887_v42 = vsel %vm876_vm5, %v4016_v16, %v849_v30  ;;  %1271 = vrot.lane.b32.xlu1 %v4009_v5, %s1832_s15  ;;  %v1487_v21 = vmul.f32 %v1471_v2, %v3163_v38  ;;  %v3215_v30 = vpop.permute.xlu0 %1122 }
 0x242   :  { %v905_v15 = vmul.f32 %v2644_v52, %v879_v47  ;;  %v906_v10 = vmul.f32 %v2647_v0, %v887_v42  ;;  %v467_v28 = vsel %vm465_vm2, %v4021_v11, %v4020_v44  ;;  %v475_v2 = vsel %vm465_vm2, %v4020_v44, %v4021_v11  ;;  %4022 = vst [vmem:[#allocation29_spill] sm:$0xff] %v3215_v30  ;;  %v4023_v47 = vld [vmem:[#allocation87_spill] sm:$0xff] }
 0x243   :  { %v1502_v54 = vmul.f32 0.044715, %v1486_v27  ;;  %v1503_v63 = vmul.f32 0.044715, %v1487_v21  ;;  %v355_v42 = vmul.f32 %v4023_v47, %v338_v17  ;;  %v4026_v17 = vld [vmem:[#allocation92_spill] sm:$0xff] }
 0x244   :  { %v3187_v23 = vmul.f32 %v3032_v61, %v905_v15  ;;  %v3190_v32 = vmul.f32 %v3032_v61, %v906_v10  ;;  %v3192_v9 = vpop.permute.xlu1 %922  ;;  %v330_v61 = vsel %vm328_vm1, %v4018_v46, %v4019_v43  ;;  %v4024_v15 = vld [vmem:[#allocation95_spill] sm:$0xff]  ;;  %v492_v46 = vmul.f32 %v2512_v7, %v475_v2 }
 0x245   :  { %1402 = vperm.xlu1 %1758, %v1392_v12   ;;  %v1518_v4 = vadd.f32 %v1502_v54, %v3161_v60  ;;  %v1519_v58 = vadd.f32 %v1503_v63, %v3163_v38  ;;  %v4025_v63 = vld [vmem:[#allocation88_spill] sm:$0xff]  ;;  %v493_v43 = vmul.f32 %v2515_v56, %v467_v28  ;;  %v4033_v28 = vld [vmem:[#allocation9_spill] sm:$0xff] }
 0x247   :  { %v1534_v14 = vmul.f32 0.7978846, %v1518_v4  ;;  %v1535_v16 = vmul.f32 0.7978846, %v1519_v58  ;;  %v356_v4 = vmul.f32 %v4025_v63, %v330_v61 }
 0x248   :  { %v1004_v27 = vpop.permute.xlu1 %1003 }
 0x249   :  { %v1017_v10 = vsel %vm1013_vm6, %v4024_v15, %v1004_v27  ;;  %v1025_v12 = vsel %vm1013_vm6, %v1004_v27, %v4024_v15  ;;  %1604 = vperm.xlu1 %1758, %v1601_v45   ;;  %1760 = vtanh.f32 %v1534_v14  ;;  %v403_v27 = vmul.f32 %v4027_v51, %v355_v42  ;;  %v4028_v45 = vld [vmem:[#allocation49_spill] sm:$0xff] }
 0x24a   :  { %v1044_v21 = vmul.f32 %v2706_v34, %v1017_v10  ;;  %v1045_v54 = vmul.f32 %v2709_v20, %v1025_v12  ;;  %1762 = vtanh.f32 %v1535_v16  ;;  %v4029_v14 = vld [vmem:[#allocation53_spill] sm:$0xff]  ;;  %v3236_v10 = vpop.permute.xlu0 %1196  ;;  %v280_v16 = vmul.f32 %v4033_v28, %v3937_v33  ;;  %v4034_v12 = vld [vmem:[#allocation18_spill] sm:$0xff] }
 0x24b   :  { %v612_v15 = vsel %vm602_vm3, %v4029_v14, %v4028_v45  ;;  %4030 = vst [vmem:[#allocation7_spill] sm:$0xff] %v3236_v10  ;;  %v281_v42 = vmul.f32 %v4033_v28, %v4012_v36  ;;  %v540_v10 = vmul.f32 %v4036_v40, %v492_v46  ;;  %v1302_v46 = vsel %vm1287_vm8, %v3150_v48, %v3136_v19 }
 0x24c   :  { %v1092_v58 = vmul.f32 %v4026_v17, %v1044_v21  ;;  %v1093_v44 = vmul.f32 %v4026_v17, %v1045_v54  ;;  %v1127_v11 = vpop.permute.xlu1 %1126  ;;  %v4035_v21 = vld [vmem:[#allocation10_spill] sm:$0xff]  ;;  %v404_v17 = vmul.f32 %v4027_v51, %v356_v4  ;;  %v629_v33 = vmul.f32 %v2524_v39, %v612_v15  ;;  %v4040_v15 = vld [vmem:[#allocation56_spill] sm:$0xff] }
 0x24d   :  { %v3248_v54 = vmul.f32 %v4035_v21, %v4034_v12  ;;  %v4037_v12 = vld [vmem:[#allocation54_spill] sm:$0xff]  ;;  %v1294_v4 = vsel %vm1287_vm8, %v3136_v19, %v3150_v48 }
 0x24e   :  { %v3239_v61 = vadd.f32 %v1092_v58, %v3054_v1  ;;  %v3242_v2 = vadd.f32 %v1093_v44, %v3056_v49  ;;  %v541_v1 = vmul.f32 %v4036_v40, %v493_v43  ;;  %v604_v49 = vsel %vm602_vm3, %v4028_v45, %v4029_v14  ;;  %v4039_v14 = vld [vmem:[#allocation60_spill] sm:$0xff] }
 0x24f   :  { %v419_v44 = vadd.f32 %v403_v27, %v280_v16  ;;  %v420_v45 = vadd.f32 %v404_v17, %v281_v42  ;;  %v331_v28 = vsel %vm328_vm1, %v4040_v15, %v4039_v14  ;;  %v339_v19 = vsel %vm328_vm1, %v4039_v14, %v4040_v15  ;;  %v4041_v16 = vld [vmem:[#allocation35_spill] sm:$0xff]  ;;  %v1354_v42 = vpop.permute.xlu0 %1353 }
 0x250   :  { %4031 = vst [vmem:[#allocation75_spill] sm:$0xff] %v3239_v61  ;;  %4032 = vst [vmem:[#allocation71_spill] sm:$0xff] %v3242_v2  ;;  %v1143_v58 = vpop.permute.xlu1 %1142  ;;  %v4038_v2 = vld [vmem:[#allocation50_spill] sm:$0xff]  ;;  %v630_v48 = vmul.f32 %v2527_v26, %v604_v49  ;;  %v1324_v24 = vmul.f32 %v3105_v55, %v1294_v4  ;;  %v1325_v14 = vmul.f32 %v3110_v31, %v1302_v46 }
 0x251   :  { %v741_v36 = vsel %vm739_vm4, %v4038_v2, %v4037_v12  ;;  %v1155_v51 = vsel %vm1150_vm7, %v1127_v11, %v1143_v58  ;;  %v1163_v40 = vsel %vm1150_vm7, %v1143_v58, %v1127_v11  ;;  %v749_v11 = vsel %vm739_vm4, %v4037_v12, %v4038_v2  ;;  %v4042_v12 = vld [vmem:[#allocation55_spill] sm:$0xff] }
 0x252   :  { %v1183_v43 = vmul.f32 %v2925_v62, %v1155_v51  ;;  %v1184_v27 = vmul.f32 %v4005_v41, %v1163_v40  ;;  %v677_v58 = vmul.f32 %v4041_v16, %v629_v33  ;;  %v4043_v40 = vld [vmem:[#allocation59_spill] sm:$0xff]  ;;  %v556_v61 = vadd.f32 %v540_v10, %v419_v44 }
 0x253   :  { %v476_v30 = vsel %vm465_vm2, %v4043_v40, %v4042_v12  ;;  %v357_v33 = vmul.f32 %v4023_v47, %v339_v19  ;;  %v358_v15 = vmul.f32 %v4025_v63, %v331_v28  ;;  %v468_v10 = vsel %vm465_vm2, %v4042_v12, %v4043_v40 }
 0x254   :  { %v1231_v17 = vmul.f32 %v3071_v6, %v1183_v43  ;;  %v1232_v51 = vmul.f32 %v3071_v6, %v1184_v27  ;;  %v3294_v2 = vpop.permute.xlu1 %1265  ;;  %v1372_v44 = vmul.f32 %v1354_v42, %v1324_v24  ;;  %v1373_v4 = vmul.f32 %v1354_v42, %v1325_v14  ;;  %v4044_v42 = vld [vmem:[#allocation16_spill] sm:$0xff] }
 0x255   :  { %v283_v19 = vmul.f32 %v4035_v21, %v3999_v59  ;;  %v678_v28 = vmul.f32 %v4041_v16, %v630_v48  ;;  %v557_v18 = vadd.f32 %v541_v1, %v420_v45  ;;  %v767_v41 = vmul.f32 %v2619_v22, %v741_v36  ;;  %v4046_v16 = vld [vmem:[#allocation58_spill] sm:$0xff] }
 0x256   :  { %v1761_v49 = vpop.eup %1760  ;;  %v3305_v43 = vadd.f32 %v1231_v17, %v3094_v3  ;;  %v3308_v6 = vadd.f32 %v1232_v51, %v3096_v57  ;;  %v494_v57 = vmul.f32 %v2512_v7, %v476_v30  ;;  %v766_v51 = vmul.f32 %v2606_v37, %v749_v11  ;;  %v4045_v30 = vld [vmem:[#allocation62_spill] sm:$0xff] }
 0x257   :  { %v1763_v27 = vpop.eup %1762  ;;  %v1566_v46 = vadd.f32 1.0, %v1761_v49  ;;  %v495_v24 = vmul.f32 %v2515_v56, %v468_v10  ;;  %v405_v12 = vmul.f32 %v4044_v42, %v357_v33  ;;  %v406_v40 = vmul.f32 %v4044_v42, %v358_v15  ;;  %v4049_v15 = vld [vmem:[#allocation24_spill] sm:$0xff] }
 0x258   :  { %v3317_v3 = vpop.permute.xlu1 %1281  ;;  %v1567_v17 = vadd.f32 1.0, %v1763_v27  ;;  %v693_v21 = vadd.f32 %v677_v58, %v556_v61  ;;  %v1388_v1 = vadd.f32 %v1372_v44, %v2982_v53  ;;  %v1389_v45 = vadd.f32 %v1373_v4, %v2985_v13  ;;  %v4047_v58 = vld [vmem:[#allocation61_spill] sm:$0xff] }
 0x259   :  { %v1582_v62 = vmul.f32 0.5, %v1566_v46  ;;  %v605_v36 = vsel %vm602_vm3, %v4046_v16, %v4045_v30  ;;  %v613_v11 = vsel %vm602_vm3, %v4045_v30, %v4046_v16  ;;  %v694_v14 = vadd.f32 %v678_v28, %v557_v18  ;;  %v4048_v53 = vld [vmem:[#allocation57_spill] sm:$0xff] }
 0x25a   :  { %v1583_v59 = vmul.f32 0.5, %v1567_v17  ;;  %v742_v13 = vsel %vm739_vm4, %v4048_v53, %v4047_v58  ;;  %v542_v27 = vmul.f32 %v4049_v15, %v494_v57  ;;  %v543_v18 = vmul.f32 %v4049_v15, %v495_v24 }
 0x25b   :  { %v1598_v48 = vmul.f32 %v1582_v62, %v3161_v60  ;;  %v750_v62 = vsel %vm739_vm4, %v4047_v58, %v4048_v53  ;;  %v422_v10 = vadd.f32 %v406_v40, %v283_v19  ;;  %v631_v44 = vmul.f32 %v2524_v39, %v613_v11  ;;  %v4050_v40 = vld [vmem:[#allocation68_spill] sm:$0xff] }
 0x25c   :  { %v1433_v49 = vpop.permute.xlu1 %1432  ;;  %v1599_v61 = vmul.f32 %v1583_v59, %v3163_v38  ;;  %v421_v38 = vadd.f32 %v405_v12, %v3248_v54  ;;  %v632_v4 = vmul.f32 %v2527_v26, %v605_v36  ;;  %v768_v17 = vmul.f32 %v2606_v37, %v750_v62  ;;  %v4052_v62 = vld [vmem:[#allocation93_spill] sm:$0xff] }
 0x25d   :  { %v3345_v60 = vadd.f32 %v1433_v49, %v1388_v1  ;;  %v3347_v33 = vadd.f32 %v1433_v49, %v1389_v45  ;;  %v769_v57 = vmul.f32 %v2619_v22, %v742_v13  ;;  %v814_v24 = vmul.f32 %v2987_v25, %v766_v51 }
 0x25e   :  { %1627 = vmatprep.subr.mxu1 %v1599_v61  ;;  %v815_v54 = vmul.f32 %v2987_v25, %v767_v41  ;;  %v558_v45 = vadd.f32 %v542_v27, %v421_v38  ;;  %v4051_v25 = vld [vmem:[#allocation30_spill] sm:$0xff]  ;;  %v816_v15 = vmul.f32 %v4052_v62, %v768_v17 }
 0x25f   :  { %v1468_v46 = vmul.f32 %v3345_v60, %v3345_v60  ;;  %v1469_v28 = vmul.f32 %v3347_v33, %v3347_v33  ;;  %1628 = vmatpush1.msra.mxu1 %v1598_v48  ;;  %v559_v48 = vadd.f32 %v543_v18, %v422_v10  ;;  %v679_v41 = vmul.f32 %v4051_v25, %v631_v44 }
 0x260   :  { %v847_v19 = vpop.permute.xlu1 %846  ;;  %v680_v16 = vmul.f32 %v4051_v25, %v632_v4  ;;  %v830_v49 = vadd.f32 %v814_v24, %v693_v21  ;;  %v831_v61 = vadd.f32 %v815_v54, %v694_v14  ;;  %v817_v38 = vmul.f32 %v4052_v62, %v769_v57  ;;  %v4053_v24 = vld [vmem:[#allocation6_spill] sm:$0xff] }
 0x261   :  { %v1484_v42 = vmul.f32 %v1468_v46, %v3345_v60  ;;  %v1485_v12 = vmul.f32 %v1469_v28, %v3347_v33  ;;  %v878_v59 = vsel %vm876_vm5, %v847_v19, %v4050_v40  ;;  %v886_v1 = vsel %vm876_vm5, %v4050_v40, %v847_v19 }
 0x262   :  { %v903_v30 = vmul.f32 %v2644_v52, %v878_v59  ;;  %v904_v51 = vmul.f32 %v2647_v0, %v886_v1  ;;  %v695_v21 = vadd.f32 %v679_v41, %v558_v45  ;;  %v696_v46 = vadd.f32 %v680_v16, %v559_v48  ;;  %v4054_v59 = vld [vmem:[#allocation63_spill] sm:$0xff]  ;;  %v1350_v41 = vpop.permute.xlu0 %1349 }
 0x263   :  { %v1500_v36 = vmul.f32 0.044715, %v1484_v42  ;;  %v1501_v11 = vmul.f32 0.044715, %v1485_v12  ;;  %v1293_v25 = vsel %vm1287_vm8, %v3294_v2, %v3317_v3 }
 0x264   :  { %v951_v58 = vmul.f32 %v3192_v9, %v903_v30  ;;  %v952_v53 = vmul.f32 %v3192_v9, %v904_v51  ;;  %v3376_v13 = vpop.permute.xlu1 %918  ;;  %v832_v9 = vadd.f32 %v816_v15, %v695_v21  ;;  %v833_v57 = vadd.f32 %v817_v38, %v696_v46 }
 0x265   :  { %v1516_v27 = vadd.f32 %v1500_v36, %v3345_v60  ;;  %v1517_v18 = vadd.f32 %v1501_v11, %v3347_v33  ;;  %v1322_v16 = vmul.f32 %v3105_v55, %v1293_v25 }
 0x266   :  { %v3382_v10 = vadd.f32 %v951_v58, %v830_v49  ;;  %v3384_v44 = vadd.f32 %v952_v53, %v831_v61  ;;  %v969_v12 = vadd.f32 %v3187_v23, %v832_v9  ;;  %v970_v40 = vadd.f32 %v3190_v32, %v833_v57 }
 0x267   :  { %v1532_v14 = vmul.f32 0.7978846, %v1516_v27  ;;  %v1533_v4 = vmul.f32 0.7978846, %v1517_v18  ;;  %v1301_v23 = vsel %vm1287_vm8, %v3317_v3, %v3294_v2  ;;  %v1370_v58 = vmul.f32 %v1350_v41, %v1322_v16  ;;  %v1346_v18 = vpop.permute.xlu0 %1345 }
 0x268   :  { %v1002_v28 = vpop.permute.xlu1 %1001  ;;  %v1323_v36 = vmul.f32 %v3110_v31, %v1301_v23  ;;  %v4055_v23 = vld [vmem:[#allocation44_spill] sm:$0xff] }
 0x269   :  { %v1016_v17 = vsel %vm1013_vm6, %v4053_v24, %v1002_v28  ;;  %v1024_v54 = vsel %vm1013_vm6, %v1002_v28, %v4053_v24  ;;  %1764 = vtanh.f32 %v1533_v4  ;;  %v1386_v2 = vadd.f32 %v1370_v58, %v3144_v8 }
 0x26a   :  { %v1042_v19 = vmul.f32 %v2706_v34, %v1016_v17  ;;  %v1043_v42 = vmul.f32 %v2709_v20, %v1024_v54  ;;  %1766 = vtanh.f32 %v1532_v14  ;;  %v1371_v53 = vmul.f32 %v1350_v41, %v1323_v36  ;;  %v4056_v41 = vld [vmem:[#allocation40_spill] sm:$0xff] }
 0x26b   :  { %v3424_v24 = vpop.permute.xlu0 %1341  ;;  %v329_v16 = vsel %vm328_vm1, %v4056_v41, %v4055_v23  ;;  %v337_v58 = vsel %vm328_vm1, %v4055_v23, %v4056_v41 }
 0x26c   :  { %v1090_v1 = vmul.f32 %v4054_v59, %v1042_v19  ;;  %v1091_v45 = vmul.f32 %v4054_v59, %v1043_v42  ;;  %v3398_v48 = vpop.permute.xlu1 %1124  ;;  %v1387_v3 = vadd.f32 %v1371_v53, %v3146_v50  ;;  %v4057_v53 = vld [vmem:[#allocation39_spill] sm:$0xff] }
 0x26e   :  { %v3400_v30 = vadd.f32 %v1090_v1, %v969_v12  ;;  %v3402_v51 = vadd.f32 %v1091_v45, %v970_v40 }
 0x26f   :  { %v3436_v42 = vpop.permute.xlu0 %1337 }
 0x270   :  { %v3412_v32 = vpop.permute.xlu1 %1140 }
 0x273   :  { %v3442_v25 = vpop.permute.xlu0 %997 }
 0x274   :  { %v1264_v11 = vpop.permute.xlu1 %1263 }
 0x276   :  { %v1765_v49 = vpop.eup %1764 }
 0x277   :  { %v1767_v61 = vpop.eup %1766  ;;  %v1565_v62 = vadd.f32 1.0, %v1765_v49 }
 0x278   :  { %v1280_v15 = vpop.permute.xlu1 %1279  ;;  %v1564_v27 = vadd.f32 1.0, %v1767_v61 }
 0x279   :  { %v1581_v38 = vmul.f32 0.5, %v1565_v62  ;;  %v1292_v36 = vsel %vm1287_vm8, %v1264_v11, %v1280_v15  ;;  %v1300_v49 = vsel %vm1287_vm8, %v1280_v15, %v1264_v11  ;;  %v4058_v62 = vld [vmem:[#allocation43_spill] sm:$0xff]  ;;  %v353_v11 = vmul.f32 %v4023_v47, %v337_v58  ;;  %v4060_v47 = vld [vmem:[#allocation5_spill] sm:$0xff] }
 0x27a   :  { %v1580_v21 = vmul.f32 0.5, %v1564_v27  ;;  %v474_v27 = vsel %vm465_vm2, %v4058_v62, %v4057_v53  ;;  %v278_v41 = vmul.f32 %v4060_v47, %v3940_v29 }
 0x27b   :  { %v1597_v14 = vmul.f32 %v1581_v38, %v3347_v33  ;;  %v354_v38 = vmul.f32 %v4025_v63, %v329_v16 }
 0x27c   :  { %v1428_v4 = vpop.permute.xlu1 %1427  ;;  %v1596_v46 = vmul.f32 %v1580_v21, %v3345_v60  ;;  %v1320_v21 = vmul.f32 %v3105_v55, %v1292_v36 }
 0x27d   :  { %v3420_v28 = vadd.f32 %v1428_v4, %v1386_v2  ;;  %v3422_v9 = vadd.f32 %v1428_v4, %v1387_v3  ;;  %1629 = vmatprep.subr.mxu1 %v1597_v14  ;;  %v1321_v2 = vmul.f32 %v3110_v31, %v1300_v49  ;;  %v3466_v3 = vpop.permute.xlu0 %1136  ;;  %v466_v14 = vsel %vm465_vm2, %v4057_v53, %v4058_v62 }
 0x27e   :  { %1630 = vmatpush1.msra.mxu1 %v1596_v46  ;;  %v490_v4 = vmul.f32 %v2512_v7, %v474_v27  ;;  %v4059_v46 = vld [vmem:[#allocation14_spill] sm:$0xff] }
 0x27f   :  { %v1466_v17 = vmul.f32 %v3420_v28, %v3420_v28  ;;  %v1467_v8 = vmul.f32 %v3422_v9, %v3422_v9  ;;  %v1369_v63 = vmul.f32 %v1346_v18, %v1321_v2 }
 0x280   :  { %v3430_v50 = vpop.permute.xlu1 %844 }
 0x281   :  { %v1482_v33 = vmul.f32 %v1466_v17, %v3420_v28  ;;  %v1483_v60 = vmul.f32 %v1467_v8, %v3422_v9  ;;  %v402_v17 = vmul.f32 %v4059_v46, %v354_v38  ;;  %v1368_v8 = vmul.f32 %v1346_v18, %v1320_v21  ;;  %v4063_v18 = vld [vmem:[#allocation27_spill] sm:$0xff]  ;;  %v3489_v36 = vpop.permute.xlu0 %1259 }
 0x282   :  { %v538_v23 = vmul.f32 %v4063_v18, %v490_v4  ;;  %v1385_v49 = vadd.f32 %v1369_v63, %v3308_v6  ;;  %v4064_v4 = vld [vmem:[#allocation45_spill] sm:$0xff] }
 0x283   :  { %v1498_v54 = vmul.f32 0.044715, %v1482_v33  ;;  %v1499_v57 = vmul.f32 0.044715, %v1483_v60  ;;  %v401_v33 = vmul.f32 %v4059_v46, %v353_v11  ;;  %v4065_v46 = vld [vmem:[#allocation41_spill] sm:$0xff] }
 0x284   :  { %v3434_v19 = vpop.permute.xlu1 %983 }
 0x285   :  { %v1514_v12 = vadd.f32 %v1498_v54, %v3420_v28  ;;  %v1515_v40 = vadd.f32 %v1499_v57, %v3422_v9  ;;  %v491_v54 = vmul.f32 %v2515_v56, %v466_v14  ;;  %v279_v57 = vmul.f32 %v4060_v47, %v4009_v5  ;;  %v4066_v47 = vld [vmem:[#allocation28_spill] sm:$0xff] }
 0x286   :  { %v1384_v5 = vadd.f32 %v1368_v8, %v3305_v43  ;;  %v417_v53 = vadd.f32 %v401_v33, %v278_v41  ;;  %v740_v43 = vsel %vm739_vm4, %v4065_v46, %v4064_v4 }
 0x287   :  { %v1530_v59 = vmul.f32 0.7978846, %v1514_v12  ;;  %v1531_v1 = vmul.f32 0.7978846, %v1515_v40  ;;  %v4061_v12 = vld [vmem:[#allocation46_spill] sm:$0xff]  ;;  %v418_v16 = vadd.f32 %v402_v17, %v279_v57  ;;  %v539_v2 = vmul.f32 %v4063_v18, %v491_v54  ;;  %v4067_v18 = vld [vmem:[#allocation76_spill] sm:$0xff] }
 0x288   :  { %v3440_v45 = vpop.permute.xlu1 %1055  ;;  %v4062_v40 = vld [vmem:[#allocation42_spill] sm:$0xff]  ;;  %v554_v54 = vadd.f32 %v538_v23, %v417_v53 }
 0x289   :  { %1768 = vtanh.f32 %v1531_v1  ;;  %v611_v7 = vsel %vm602_vm3, %v4061_v12, %v4062_v40  ;;  %v555_v17 = vadd.f32 %v539_v2, %v418_v16  ;;  %v765_v16 = vmul.f32 %v2619_v22, %v740_v43  ;;  %v4070_v2 = vld [vmem:[#allocation38_spill] sm:$0xff] }
 0x28a   :  { %1770 = vtanh.f32 %v1530_v59  ;;  %v603_v59 = vsel %vm602_vm3, %v4062_v40, %v4061_v12  ;;  %v627_v62 = vmul.f32 %v2524_v39, %v611_v7  ;;  %v748_v39 = vsel %vm739_vm4, %v4064_v4, %v4065_v46  ;;  %v3520_v7 = vpop.permute.xlu0 %1333 }
 0x28b   :  { %v628_v27 = vmul.f32 %v2527_v26, %v603_v59  ;;  %v1154_v26 = vsel %vm1150_vm7, %v3398_v48, %v3412_v32  ;;  %v764_v23 = vmul.f32 %v2606_v37, %v748_v39  ;;  %v813_v4 = vmul.f32 %v4070_v2, %v765_v16 }
 0x28c   :  { %v3452_v61 = vpop.permute.xlu1 %1138  ;;  %v675_v57 = vmul.f32 %v4066_v47, %v627_v62  ;;  %v1181_v41 = vmul.f32 %v4067_v18, %v1154_v26 }
 0x28d   :  { %v676_v12 = vmul.f32 %v4066_v47, %v628_v27  ;;  %v4072_v47 = vld [vmem:[#allocation75_spill] sm:$0xff] }
 0x28e   :  { %v3542_v43 = vpop.permute.xlu0 %1118 }
 0x28f   :  { %v692_v53 = vadd.f32 %v676_v12, %v555_v17  ;;  %v4073_v12 = vld [vmem:[#allocation29_spill] sm:$0xff] }
 0x290   :  { %v1262_v15 = vpop.permute.xlu1 %1261 }
 0x294   :  { %v1278_v60 = vpop.permute.xlu1 %1277 }
 0x295   :  { %v1299_v62 = vsel %vm1287_vm8, %v1278_v60, %v1262_v15 }
 0x296   :  { %v1769_v1 = vpop.eup %1768  ;;  %v1319_v39 = vmul.f32 %v3110_v31, %v1299_v62 }
 0x297   :  { %v1771_v56 = vpop.eup %1770  ;;  %v1563_v58 = vadd.f32 1.0, %v1769_v1  ;;  %v1162_v1 = vsel %vm1150_vm7, %v3412_v32, %v3398_v48  ;;  %v4068_v48 = vld [vmem:[#allocation72_spill] sm:$0xff] }
 0x298   :  { %v1423_v38 = vpop.permute.xlu1 %1422  ;;  %v1562_v21 = vadd.f32 1.0, %v1771_v56  ;;  %v1182_v32 = vmul.f32 %v4068_v48, %v1162_v1  ;;  %v1161_v1 = vsel %vm1150_vm7, %v3452_v61, %v4073_v12 }
 0x299   :  { %v3496_v11 = vadd.f32 %v1423_v38, %v1384_v5  ;;  %v3498_v29 = vadd.f32 %v1423_v38, %v1385_v49  ;;  %v1579_v14 = vmul.f32 0.5, %v1563_v58  ;;  %v691_v58 = vadd.f32 %v675_v57, %v554_v54  ;;  %v4069_v38 = vld [vmem:[#allocation69_spill] sm:$0xff] }
 0x29a   :  { %v1578_v6 = vmul.f32 0.5, %v1562_v21  ;;  %v1229_v21 = vmul.f32 %v4069_v38, %v1181_v41  ;;  %v1180_v62 = vmul.f32 %v4068_v48, %v1161_v1 }
 0x29b   :  { %v1464_v8 = vmul.f32 %v3496_v11, %v3496_v11  ;;  %v1465_v63 = vmul.f32 %v3498_v29, %v3498_v29  ;;  %v1595_v33 = vmul.f32 %v1579_v14, %v3422_v9  ;;  %v812_v14 = vmul.f32 %v4070_v2, %v764_v23 }
 0x29c   :  { %v982_v40 = vpop.permute.xlu1 %981  ;;  %v1594_v59 = vmul.f32 %v1578_v6, %v3420_v28  ;;  %v1291_v28 = vsel %vm1287_vm8, %v1262_v15, %v1278_v60  ;;  %v1230_v15 = vmul.f32 %v4069_v38, %v1182_v32  ;;  %v3546_v60 = vadd.f32 %v813_v4, %v692_v53  ;;  %v1258_v53 = vpop.permute.xlu0 %1257 }
 0x29d   :  { %v1480_v56 = vmul.f32 %v1464_v8, %v3496_v11  ;;  %v1481_v9 = vmul.f32 %v1465_v63, %v3498_v29  ;;  %1631 = vmatprep.subr.mxu1 %v1595_v33  ;;  %v1318_v46 = vmul.f32 %v3105_v55, %v1291_v28  ;;  %v3548_v17 = vadd.f32 %v812_v14, %v691_v58  ;;  %v4071_v63 = vld [vmem:[#allocation66_spill] sm:$0xff]  ;;  %v4075_v58 = vld [vmem:[#allocation71_spill] sm:$0xff] }
 0x29e   :  { %1632 = vmatpush1.msra.mxu1 %v1594_v59  ;;  %v1015_v33 = vsel %vm1013_vm6, %v3434_v19, %v4071_v63  ;;  %v1023_v54 = vsel %vm1013_vm6, %v4071_v63, %v3434_v19  ;;  %v1245_v57 = vadd.f32 %v1229_v21, %v4072_v47  ;;  %v1153_v59 = vsel %vm1150_vm7, %v4073_v12, %v3452_v61 }
 0x29f   :  { %v1496_v5 = vmul.f32 0.044715, %v1480_v56  ;;  %v1497_v49 = vmul.f32 0.044715, %v1481_v9  ;;  %v1366_v41 = vmul.f32 %v3424_v24, %v1318_v46  ;;  %v4074_v56 = vld [vmem:[#allocation70_spill] sm:$0xff]  ;;  %v1367_v9 = vmul.f32 %v3424_v24, %v1319_v39  ;;  %v4076_v46 = vld [vmem:[#allocation17_spill] sm:$0xff] }
 0x2a0   :  { %v1121_v27 = vpop.permute.xlu1 %1120  ;;  %v877_v19 = vsel %vm876_vm5, %v3430_v50, %v4074_v56  ;;  %v885_v61 = vsel %vm876_vm5, %v4074_v56, %v3430_v50  ;;  %v1040_v28 = vmul.f32 %v2706_v34, %v1015_v33  ;;  %v1246_v24 = vadd.f32 %v1230_v15, %v4075_v58  ;;  %v4077_v15 = vld [vmem:[#allocation65_spill] sm:$0xff] }
 0x2a1   :  { %v1512_v37 = vadd.f32 %v1496_v5, %v3496_v11  ;;  %v1513_v22 = vadd.f32 %v1497_v49, %v3498_v29  ;;  %v1152_v23 = vsel %vm1150_vm7, %v1121_v27, %v3466_v3  ;;  %v1160_v16 = vsel %vm1150_vm7, %v3466_v3, %v1121_v27 }
 0x2a2   :  { %v1041_v5 = vmul.f32 %v2709_v20, %v1023_v54  ;;  %v1179_v32 = vmul.f32 %v4067_v18, %v1153_v59  ;;  %v901_v27 = vmul.f32 %v2644_v52, %v877_v19  ;;  %v1177_v38 = vmul.f32 %v4067_v18, %v1152_v23  ;;  %v3620_v59 = vpop.permute.xlu0 %1329 }
 0x2a3   :  { %v1528_v26 = vmul.f32 0.7978846, %v1512_v37  ;;  %v1529_v6 = vmul.f32 0.7978846, %v1513_v22  ;;  %v1178_v21 = vmul.f32 %v4068_v48, %v1160_v16  ;;  %v1382_v37 = vadd.f32 %v1366_v41, %v1245_v57 }
 0x2a4   :  { %v3550_v8 = vpop.permute.xlu1 %1192  ;;  %v1014_v22 = vsel %vm1013_vm6, %v982_v40, %v3442_v25  ;;  %v1022_v2 = vsel %vm1013_vm6, %v3442_v25, %v982_v40  ;;  %v1383_v4 = vadd.f32 %v1367_v9, %v1246_v24  ;;  %v1088_v52 = vmul.f32 %v4076_v46, %v1040_v28 }
 0x2a5   :  { %1772 = vtanh.f32 %v1529_v6  ;;  %v1089_v39 = vmul.f32 %v4076_v46, %v1041_v5  ;;  %v1227_v63 = vmul.f32 %v4077_v15, %v1179_v32  ;;  %v1228_v33 = vmul.f32 %v4077_v15, %v1180_v62 }
 0x2a6   :  { %1774 = vtanh.f32 %v1528_v26  ;;  %v1038_v25 = vmul.f32 %v2706_v34, %v1014_v22  ;;  %v1039_v40 = vmul.f32 %v2709_v20, %v1022_v2  ;;  %v949_v1 = vmul.f32 %v3376_v13, %v901_v27 }
 0x2a7   :  { %v1104_v23 = vadd.f32 %v1088_v52, %v3382_v10  ;;  %v1105_v16 = vadd.f32 %v1089_v39, %v3384_v44  ;;  %v1243_v5 = vadd.f32 %v1227_v63, %v3400_v30 }
 0x2a8   :  { %v1276_v49 = vpop.permute.xlu1 %1275  ;;  %v1086_v24 = vmul.f32 %v3440_v45, %v1038_v25 }
 0x2a9   :  { %v1290_v3 = vsel %vm1287_vm8, %v3489_v36, %v1276_v49  ;;  %v1298_v50 = vsel %vm1287_vm8, %v1276_v49, %v3489_v36  ;;  %v902_v36 = vmul.f32 %v2647_v0, %v885_v61  ;;  %v4078_v0 = vld [vmem:[#allocation7_spill] sm:$0xff]  ;;  %v1244_v49 = vadd.f32 %v1228_v33, %v3402_v51 }
 0x2aa   :  { %v1316_v14 = vmul.f32 %v3105_v55, %v1290_v3  ;;  %v1317_v26 = vmul.f32 %v3110_v31, %v1298_v50  ;;  %v1225_v57 = vmul.f32 %v4078_v0, %v1177_v38  ;;  %v1226_v12 = vmul.f32 %v4078_v0, %v1178_v21 }
 0x2ab   :  { %v950_v34 = vmul.f32 %v3376_v13, %v902_v36  ;;  %v1087_v13 = vmul.f32 %v3440_v45, %v1039_v40  ;;  %v965_v40 = vadd.f32 %v949_v1, %v3548_v17 }
 0x2ac   :  { %v1418_v6 = vpop.permute.xlu1 %1417  ;;  %v1364_v41 = vmul.f32 %v3436_v42, %v1316_v14  ;;  %v1365_v20 = vmul.f32 %v3436_v42, %v1317_v26  ;;  %v1241_v32 = vadd.f32 %v1225_v57, %v1104_v23  ;;  %v1242_v42 = vadd.f32 %v1226_v12, %v1105_v16 }
 0x2ad   :  { %v3612_v54 = vadd.f32 %v1418_v6, %v1382_v37  ;;  %v3614_v47 = vadd.f32 %v1418_v6, %v1383_v4  ;;  %v1256_v37 = vpop.permute.xlu0 %1255  ;;  %v1102_v1 = vadd.f32 %v1086_v24, %v965_v40 }
 0x2ae   :  { %v1380_v50 = vadd.f32 %v1364_v41, %v1243_v5  ;;  %v1381_v38 = vadd.f32 %v1365_v20, %v1244_v49 }
 0x2af   :  { %v1462_v56 = vmul.f32 %v3612_v54, %v3612_v54  ;;  %v1463_v19 = vmul.f32 %v3614_v47, %v3614_v47 }
 0x2b0   :  { %v1135_v9 = vpop.permute.xlu1 %1134 }
 0x2b1   :  { %v1478_v61 = vmul.f32 %v1462_v56, %v3612_v54  ;;  %v1479_v28 = vmul.f32 %v1463_v19, %v3614_v47  ;;  %v1151_v27 = vsel %vm1150_vm7, %v3542_v43, %v1135_v9  ;;  %v1159_v30 = vsel %vm1150_vm7, %v1135_v9, %v3542_v43  ;;  %v1408_v12 = vpop.permute.xlu0 %1407 }
 0x2b2   :  { %v1773_v58 = vpop.eup %1772  ;;  %v1175_v26 = vmul.f32 %v4067_v18, %v1151_v27  ;;  %v1176_v6 = vmul.f32 %v4068_v48, %v1159_v30  ;;  %v966_v18 = vadd.f32 %v950_v34, %v3546_v60 }
 0x2b3   :  { %v1775_v62 = vpop.eup %1774  ;;  %v1494_v3 = vmul.f32 0.044715, %v1478_v61  ;;  %v1495_v10 = vmul.f32 0.044715, %v1479_v28  ;;  %v1561_v44 = vadd.f32 1.0, %v1773_v58 }
 0x2b4   :  { %v1274_v51 = vpop.permute.xlu1 %1273  ;;  %v1560_v21 = vadd.f32 1.0, %v1775_v62  ;;  %v1103_v56 = vadd.f32 %v1087_v13, %v966_v18 }
 0x2b5   :  { %v1510_v45 = vadd.f32 %v1494_v3, %v3612_v54  ;;  %v1511_v22 = vadd.f32 %v1495_v10, %v3614_v47  ;;  %v1289_v2 = vsel %vm1287_vm8, %v1258_v53, %v1274_v51  ;;  %v1297_v14 = vsel %vm1287_vm8, %v1274_v51, %v1258_v53 }
 0x2b6   :  { %v1314_v4 = vmul.f32 %v3105_v55, %v1289_v2  ;;  %v1315_v36 = vmul.f32 %v3110_v31, %v1297_v14  ;;  %v1577_v46 = vmul.f32 0.5, %v1561_v44  ;;  %v1576_v43 = vmul.f32 0.5, %v1560_v21 }
 0x2b7   :  { %v1526_v52 = vmul.f32 0.7978846, %v1510_v45  ;;  %v1527_v39 = vmul.f32 0.7978846, %v1511_v22 }
 0x2b8   :  { %v1413_v15 = vpop.permute.xlu1 %1412  ;;  %v1593_v63 = vmul.f32 %v1577_v46, %v3498_v29  ;;  %v1592_v33 = vmul.f32 %v1576_v43, %v3496_v11  ;;  %v1362_v25 = vmul.f32 %v3520_v7, %v1314_v4  ;;  %v1363_v53 = vmul.f32 %v3520_v7, %v1315_v36 }
 0x2b9   :  { %v3659_v0 = vadd.f32 %v1413_v15, %v1380_v50  ;;  %v3661_v57 = vadd.f32 %v1413_v15, %v1381_v38  ;;  %1776 = vtanh.f32 %v1527_v39  ;;  %v1223_v11 = vmul.f32 %v3550_v8, %v1175_v26 }
 0x2ba   :  { %1633 = vmatprep.subr.mxu1 %v1593_v63  ;;  %v1378_v48 = vadd.f32 %v1362_v25, %v1241_v32  ;;  %v1379_v41 = vadd.f32 %v1363_v53, %v1242_v42  ;;  %1778 = vtanh.f32 %v1526_v52  ;;  %v1224_v29 = vmul.f32 %v3550_v8, %v1176_v6 }
 0x2bb   :  { %v1460_v7 = vmul.f32 %v3659_v0, %v3659_v0  ;;  %v1461_v17 = vmul.f32 %v3661_v57, %v3661_v57  ;;  %1634 = vmatpush1.msra.mxu1 %v1592_v33  ;;  %v1239_v13 = vadd.f32 %v1223_v11, %v1102_v1 }
 0x2bc   :  { %v3670_v19 = vadd.f32 %v1408_v12, %v1378_v48  ;;  %v3672_v60 = vadd.f32 %v1408_v12, %v1379_v41  ;;  %v1272_v34 = vpop.permute.xlu1 %1271  ;;  %v1240_v24 = vadd.f32 %v1224_v29, %v1103_v56 }
 0x2bd   :  { %v1476_v20 = vmul.f32 %v1460_v7, %v3659_v0  ;;  %v1477_v9 = vmul.f32 %v1461_v17, %v3661_v57  ;;  %v1288_v8 = vsel %vm1287_vm8, %v1256_v37, %v1272_v34  ;;  %v1296_v23 = vsel %vm1287_vm8, %v1272_v34, %v1256_v37 }
 0x2be   :  { %v1458_v16 = vmul.f32 %v3670_v19, %v3670_v19  ;;  %v1459_v61 = vmul.f32 %v3672_v60, %v3672_v60  ;;  %v1312_v28 = vmul.f32 %v3105_v55, %v1288_v8  ;;  %v1313_v5 = vmul.f32 %v3110_v31, %v1296_v23 }
 0x2bf   :  { %v1492_v49 = vmul.f32 0.044715, %v1476_v20  ;;  %v1493_v58 = vmul.f32 0.044715, %v1477_v9 }
 0x2c0   :  { %v1474_v32 = vmul.f32 %v1458_v16, %v3670_v19  ;;  %v1475_v42 = vmul.f32 %v1459_v61, %v3672_v60  ;;  %v1360_v35 = vmul.f32 %v3620_v59, %v1312_v28  ;;  %v1361_v62 = vmul.f32 %v3620_v59, %v1313_v5  ;;  %v1403_v51 = vpop.permute.xlu1 %1402 }
 0x2c1   :  { %v1508_v3 = vadd.f32 %v1492_v49, %v3659_v0  ;;  %v1509_v10 = vadd.f32 %v1493_v58, %v3661_v57 }
 0x2c2   :  { %v1490_v50 = vmul.f32 0.044715, %v1474_v32  ;;  %v1491_v55 = vmul.f32 0.044715, %v1475_v42  ;;  %v1377_v44 = vadd.f32 %v1361_v62, %v1240_v24  ;;  %v1376_v31 = vadd.f32 %v1360_v35, %v1239_v13 }
 0x2c3   :  { %v1524_v27 = vmul.f32 0.7978846, %v1508_v3  ;;  %v1525_v30 = vmul.f32 0.7978846, %v1509_v10 }
 0x2c4   :  { %v1506_v38 = vadd.f32 %v1490_v50, %v3670_v19  ;;  %v1507_v21 = vadd.f32 %v1491_v55, %v3672_v60  ;;  %v1440_v37 = vadd.f32 %v1403_v51, %v1376_v31  ;;  %v1441_v45 = vadd.f32 %v1403_v51, %v1377_v44 }
 0x2c5   :  { %1780 = vtanh.f32 %v1525_v30 }
 0x2c6   :  { %v1777_v22 = vpop.eup %1776  ;;  %v1522_v59 = vmul.f32 0.7978846, %v1506_v38  ;;  %v1523_v2 = vmul.f32 0.7978846, %v1507_v21  ;;  %v1456_v14 = vmul.f32 %v1440_v37, %v1440_v37  ;;  %v1457_v4 = vmul.f32 %v1441_v45, %v1441_v45 }
 0x2c7   :  { %v1779_v36 = vpop.eup %1778  ;;  %v1559_v46 = vadd.f32 1.0, %v1777_v22  ;;  %1782 = vtanh.f32 %v1524_v27 }
 0x2c8   :  { %1784 = vtanh.f32 %v1522_v59  ;;  %v1472_v43 = vmul.f32 %v1456_v14, %v1440_v37  ;;  %v1473_v52 = vmul.f32 %v1457_v4, %v1441_v45  ;;  %v1558_v39 = vadd.f32 1.0, %v1779_v36 }
 0x2c9   :  { %1786 = vtanh.f32 %v1523_v2  ;;  %v1575_v26 = vmul.f32 0.5, %v1559_v46 }
 0x2ca   :  { %v1488_v6 = vmul.f32 0.044715, %v1472_v43  ;;  %v1489_v15 = vmul.f32 0.044715, %v1473_v52  ;;  %v1574_v63 = vmul.f32 0.5, %v1558_v39 }
 0x2cb   :  { %v1591_v33 = vmul.f32 %v1575_v26, %v3614_v47 }
 0x2cc   :  { %v1504_v25 = vadd.f32 %v1488_v6, %v1440_v37  ;;  %v1505_v53 = vadd.f32 %v1489_v15, %v1441_v45  ;;  %v1590_v40 = vmul.f32 %v1574_v63, %v3612_v54 }
 0x2cd   :  { %1635 = vmatprep.subr.mxu1 %v1591_v33 }
 0x2ce   :  { %v1520_v12 = vmul.f32 0.7978846, %v1504_v25  ;;  %v1521_v18 = vmul.f32 0.7978846, %v1505_v53  ;;  %1636 = vmatpush1.msra.mxu1 %v1590_v40 }
 0x2d0   :  { %1788 = vtanh.f32 %v1521_v18 }
 0x2d1   :  { %1790 = vtanh.f32 %v1520_v12 }
 0x2d2   :  { %v1781_v48 = vpop.eup %1780 }
 0x2d3   :  { %v1557_v41 = vadd.f32 1.0, %v1781_v48 }
 0x2d4   :  { %v1783_v11 = vpop.eup %1782 }
 0x2d5   :  { %v1785_v29 = vpop.eup %1784  ;;  %v1573_v7 = vmul.f32 0.5, %v1557_v41  ;;  %v1556_v17 = vadd.f32 1.0, %v1783_v11 }
 0x2d6   :  { %v1787_v1 = vpop.eup %1786  ;;  %v1554_v56 = vadd.f32 1.0, %v1785_v29 }
 0x2d7   :  { %v1589_v47 = vmul.f32 %v1573_v7, %v3661_v57  ;;  %v1572_v34 = vmul.f32 0.5, %v1556_v17  ;;  %v1555_v20 = vadd.f32 1.0, %v1787_v1 }
 0x2d8   :  { %v1570_v9 = vmul.f32 0.5, %v1554_v56 }
 0x2d9   :  { %1637 = vmatprep.subr.mxu1 %v1589_v47  ;;  %v1588_v54 = vmul.f32 %v1572_v34, %v3659_v0  ;;  %v1571_v8 = vmul.f32 0.5, %v1555_v20  ;;  %v1600_v0 = vld [vmem:[%s3711_s5] sm:$0xff] }
 0x2da   :  { %v1586_v23 = vmul.f32 %v1570_v9, %v3670_v19  ;;  %v1605_v19 = vpop.permute.xlu1 %1604 }
 0x2db   :  { %1638 = vmatpush1.msra.mxu1 %v1588_v54  ;;  %v1587_v16 = vmul.f32 %v1571_v8, %v3672_v60 }
 0x2dd   :  { %v1789_v61 = vpop.eup %1788  ;;  %1639 = vmatprep.subr.mxu1 %v1587_v16 }
 0x2de   :  { %v1791_v28 = vpop.eup %1790  ;;  %1640 = vmatpush1.msra.mxu1 %v1586_v23  ;;  %v1553_v5 = vadd.f32 1.0, %v1789_v61 }
 0x2df   :  { %v1552_v49 = vadd.f32 1.0, %v1791_v28 }
 0x2e0   :  { %v1569_v58 = vmul.f32 0.5, %v1553_v5 }
 0x2e1   :  { %v1568_v57 = vmul.f32 0.5, %v1552_v49 }
 0x2e2   :  { %v1585_v24 = vmul.f32 %v1569_v58, %v1441_v45 }
 0x2e3   :  { %v1584_v13 = vmul.f32 %v1568_v57, %v1440_v37 }
 0x2e4   :  { %1641 = vmatprep.subr.mxu1 %v1585_v24 }
 0x2e5   :  { %1642 = vmatpush1.msra.mxu1 %v1584_v13 }
 0x2e6   :  { %1708 = vmatmul.mubr.msk.f32.vlgmr.msra.gmra.mxu1 %vm1607_vm9, %v1600_v0 }
 0x3a6   :  { %v1677_v60 = vpop.f32.mrf.mxu1 }
 0x3a7   :  { %v1678_v32 = vadd.f32 %v1677_v60, %v1605_v19 }
 0x3a8   :  { %v1679_v42 = vpop.f32.mrf.mxu1 }
 0x3a9   :  { %1682 = vst [vmem:[#allocation2] sm:$0xff] %v1678_v32  ;;  %v1680_v35 = vadd.f32 %v1679_v42, %v1605_v19 }
 0x3ab   :  { %1683 = vst [vmem:[#allocation2 + $0x8] sm:$0xff] %v1680_v35 }
 0x3ac   :  { %1804 = shalt.err (!%p1801_p4)
}
 0x3ad   :  { %1693 = dma.vmem_to_hbm [thread:$0]  %s1691_s18, 256, %s3714_s8, [#allocation3]  }
 0x3ae   :  { %1813 = dma.done.wait [#allocation3], 256  }
 0x3af   :  { %1814 = vsyncadd [#allocation3], 4294967040 }
 0x3b0   :  { %1697 = vsyncpa [#allocation3], 1 }

</bundles_post_ra>
